<compile_context>
chip_gen: v6e
topology: v6e:2x2x1
jax: 0.10.0
libtpu: 0.0.40
codegen_flags: <defaults>
</compile_context>

<pallas_src>
import functools

import jax
import jax.numpy as jnp
from jax.experimental import pallas as pl
from jax.experimental.pallas import tpu as pltpu

# ---------------- tiny BART-like config ----------------
VOCAB = 64
D_MODEL = 32
N_HEADS = 2
D_HEAD = D_MODEL // N_HEADS
D_FF = 64
N_ENC_LAYERS = 1
N_DEC_LAYERS = 1
MAX_POS = 64
PAD_ID = 1
DECODER_START_ID = 2   # bart-base: decoder_start_token_id == eos
POS_OFFSET = 2         # BartLearnedPositionalEmbedding offset quirk
NEG_INF = -1e9

# TODO(synk): BartTokenizer (string -> ids) has no Pallas equivalent; inputs are
# pre-tokenized integer ids. Pretrained checkpoint weights are replaced by
# deterministic random init (same parameter structure, tiny dims).


# ---------------- in-kernel helpers ----------------
def _ln(x, g, b):
    """Fused (residual-already-added) layernorm. x: (T, D) f32, g/b: (1, D)."""
    mean = jnp.mean(x, axis=-1, keepdims=True)
    var = jnp.mean((x - mean) ** 2, axis=-1, keepdims=True)
    return (x - mean) * jax.lax.rsqrt(var + 1e-5) * g + b


def _attend(q, k, v, wo, bo, bias, scale):
    """Multi-head attention + output projection, all in vregs.

    q: (Tq, D), k/v: (Tk, D), wo: (D, D), bo: (1, D), bias: broadcastable to
    (Tq, Tk). Heads are static slices of the packed projections; the per-head
    output is folded into the out-projection accumulation (no concat)."""
    tq = q.shape[0]
    out = jnp.zeros((tq, D_MODEL), jnp.float32)
    for h in range(N_HEADS):
        lo, hi = h * D_HEAD, (h + 1) * D_HEAD
        qh = q[:, lo:hi] * scale                       # fold scale into q (Tq*Dh mul)
        s = jnp.dot(qh, k[:, lo:hi].T, preferred_element_type=jnp.float32) + bias
        m = jnp.max(s, axis=-1, keepdims=True)
        p = jnp.exp(s - m)
        denom = jnp.sum(p, axis=-1, keepdims=True)
        oh = jnp.dot(p, v[:, lo:hi], preferred_element_type=jnp.float32) \
            * pl.reciprocal(denom, approx=True)        # EUP reciprocal
        out = out + jnp.dot(oh, wo[lo:hi, :], preferred_element_type=jnp.float32)
    return out + bo


def _ffn(x, w1, b1, w2, b2):
    # TODO(synk): BART uses exact (erf) GELU; tanh approximation used here for
    # guaranteed Mosaic lowering (numerically ~1e-3 close).
    h = jax.nn.gelu(jnp.dot(x, w1, preferred_element_type=jnp.float32) + b1,
                    approximate=True)
    return jnp.dot(h, w2, preferred_element_type=jnp.float32) + b2


# ---------------- fused encoder kernel (one grid step per batch row) ----------------
def _encoder_kernel(x_ref, mask_ref, g_emb_ref, b_emb_ref,
                    wqkv_ref, bqkv_ref, wo_ref, bo_ref, g_sa_ref, b_sa_ref,
                    w1_ref, b1_ref, w2_ref, b2_ref, g_ff_ref, b_ff_ref,
                    o_ref):
    x = x_ref[0].astype(jnp.float32)                   # (S, D)
    mask = mask_ref[0]                                 # (1, S)
    self_bias = (1.0 - mask) * NEG_INF                 # broadcast over query rows
    x = _ln(x, g_emb_ref[...], b_emb_ref[...])
    scale = 1.0 / (D_HEAD ** 0.5)
    for l in range(N_ENC_LAYERS):
        qkv = jnp.dot(x, wqkv_ref[l], preferred_element_type=jnp.float32) + bqkv_ref[l]
        a = _attend(qkv[:, :D_MODEL], qkv[:, D_MODEL:2 * D_MODEL], qkv[:, 2 * D_MODEL:],
                    wo_ref[l], bo_ref[l], self_bias, scale)
        x = _ln(x + a, g_sa_ref[l], b_sa_ref[l])       # residual fused into LN
        f = _ffn(x, w1_ref[l], b1_ref[l], w2_ref[l], b2_ref[l])
        x = _ln(x + f, g_ff_ref[l], b_ff_ref[l])
    o_ref[0] = x.astype(o_ref.dtype)


# ---------------- fused decoder + LM head + loss kernel ----------------
def _decoder_kernel(x_ref, enc_ref, mask_ref, lab_ref,
                    g_emb_ref, b_emb_ref,
                    s_wqkv_ref, s_bqkv_ref, s_wo_ref, s_bo_ref, s_g_ref, s_b_ref,
                    c_wq_ref, c_bq_ref, c_wkv_ref, c_bkv_ref, c_wo_ref, c_bo_ref,
                    c_g_ref, c_b_ref,
                    w1_ref, b1_ref, w2_ref, b2_ref, f_g_ref, f_b_ref,
                    lm_w_ref, lm_b_ref,
                    logits_ref, nll_ref):
    x = x_ref[0].astype(jnp.float32)                   # (T, D)
    enc = enc_ref[0].astype(jnp.float32)               # (S, D)
    mask = mask_ref[0]                                 # (1, S)
    lab = lab_ref[0]                                   # (T, 1) int32
    t = x.shape[0]

    cross_bias = (1.0 - mask) * NEG_INF                # (1, S)
    row = jax.lax.broadcasted_iota(jnp.int32, (t, t), 0)
    col = jax.lax.broadcasted_iota(jnp.int32, (t, t), 1)
    causal_bias = jnp.where(col <= row, 0.0, NEG_INF)  # (T, T), built in-kernel

    x = _ln(x, g_emb_ref[...], b_emb_ref[...])
    scale = 1.0 / (D_HEAD ** 0.5)
    for l in range(N_DEC_LAYERS):
        # -- causal self attention (packed QKV) --
        qkv = jnp.dot(x, s_wqkv_ref[l], preferred_element_type=jnp.float32) + s_bqkv_ref[l]
        a = _attend(qkv[:, :D_MODEL], qkv[:, D_MODEL:2 * D_MODEL], qkv[:, 2 * D_MODEL:],
                    s_wo_ref[l], s_bo_ref[l], causal_bias, scale)
        x = _ln(x + a, s_g_ref[l], s_b_ref[l])
        # -- cross attention (packed KV over encoder output) --
        q = jnp.dot(x, c_wq_ref[l], preferred_element_type=jnp.float32) + c_bq_ref[l]
        kv = jnp.dot(enc, c_wkv_ref[l], preferred_element_type=jnp.float32) + c_bkv_ref[l]
        c = _attend(q, kv[:, :D_MODEL], kv[:, D_MODEL:],
                    c_wo_ref[l], c_bo_ref[l], cross_bias, scale)
        x = _ln(x + c, c_g_ref[l], c_b_ref[l])
        # -- feed forward --
        f = _ffn(x, w1_ref[l], b1_ref[l], w2_ref[l], b2_ref[l])
        x = _ln(x + f, f_g_ref[l], f_b_ref[l])

    # -- tied LM head + log-softmax + masked NLL, fused (no HBM round-trip) --
    logits = jnp.dot(x, lm_w_ref[...], preferred_element_type=jnp.float32) + lm_b_ref[...]
    m = jnp.max(logits, axis=-1, keepdims=True)
    z = logits - m
    lse = jnp.log(jnp.sum(jnp.exp(z), axis=-1, keepdims=True))
    logp = z - lse                                      # (T, V)
    ids = jax.lax.broadcasted_iota(jnp.int32, logits.shape, 1)
    onehot = (ids == lab).astype(jnp.float32)           # no gather / no OOB for -100
    nll = -jnp.sum(logp * onehot, axis=-1, keepdims=True)
    valid = (lab != -100).astype(jnp.float32)           # CrossEntropyLoss(ignore_index=-100)
    logits_ref[0] = logits.astype(logits_ref.dtype)
    nll_ref[0] = (nll * valid).astype(nll_ref.dtype)


# ---------------- pallas_call wrappers ----------------
def _full_spec(a):
    n = a.ndim
    return pl.BlockSpec(a.shape, lambda b, n=n: (0,) * n)


def run_encoder(enc_x0, mask3, params):
    B, S, D = enc_x0.shape
    e = params["enc"]
    ins = [enc_x0, mask3, params["enc_ln_emb_g"], params["enc_ln_emb_b"],
           e["wqkv"], e["bqkv"], e["wo"], e["bo"], e["g_sa"], e["b_sa"],
           e["w1"], e["b1"], e["w2"], e["b2"], e["g_ff"], e["b_ff"]]
    in_specs = [pl.BlockSpec((1, S, D), lambda b: (b, 0, 0)),
                pl.BlockSpec((1, 1, S), lambda b: (b, 0, 0))] \
        + [_full_spec(a) for a in ins[2:]]
    return pl.pallas_call(
        _encoder_kernel,
        out_shape=jax.ShapeDtypeStruct((B, S, D), jnp.float32),
        grid=(B,),
        in_specs=in_specs,
        out_specs=pl.BlockSpec((1, S, D), lambda b: (b, 0, 0)),
        compiler_params=pltpu.CompilerParams(dimension_semantics=("parallel",)),
    )(*ins)


def run_decoder(dec_x0, enc_out, mask3, lab3, params):
    B, T, D = dec_x0.shape
    S = enc_out.shape[1]
    d = params["dec"]
    lm_w = params["shared_emb"].T                       # tied LM head (D, VOCAB)
    ins = [dec_x0, enc_out, mask3, lab3,
           params["dec_ln_emb_g"], params["dec_ln_emb_b"],
           d["wqkv"], d["bqkv"], d["wo"], d["bo"], d["g_sa"], d["b_sa"],
           d["c_wq"], d["c_bq"], d["c_wkv"], d["c_bkv"], d["c_wo"], d["c_bo"],
           d["g_ca"], d["b_ca"],
           d["w1"], d["b1"], d["w2"], d["b2"], d["g_ff"], d["b_ff"],
           lm_w, params["final_logits_bias"]]
    in_specs = [pl.BlockSpec((1, T, D), lambda b: (b, 0, 0)),
                pl.BlockSpec((1, S, D), lambda b: (b, 0, 0)),
                pl.BlockSpec((1, 1, S), lambda b: (b, 0, 0)),
                pl.BlockSpec((1, T, 1), lambda b: (b, 0, 0))] \
        + [_full_spec(a) for a in ins[4:]]
    out_shape = (jax.ShapeDtypeStruct((B, T, VOCAB), jnp.float32),
                 jax.ShapeDtypeStruct((B, T, 1), jnp.float32))
    out_specs = (pl.BlockSpec((1, T, VOCAB), lambda b: (b, 0, 0)),
                 pl.BlockSpec((1, T, 1), lambda b: (b, 0, 0)))
    return pl.pallas_call(
        _decoder_kernel,
        out_shape=out_shape,
        grid=(B,),
        in_specs=in_specs,
        out_specs=out_specs,
        compiler_params=pltpu.CompilerParams(dimension_semantics=("parallel",)),
    )(*ins)


# ---------------- model glue (embedding gathers + tiny scalar loss reduce) ----------------
def shift_tokens_right(labels):
    B = labels.shape[0]
    start = jnp.full((B, 1), DECODER_START_ID, labels.dtype)
    shifted = jnp.concatenate([start, labels[:, :-1]], axis=1)
    return jnp.where(shifted == -100, PAD_ID, shifted)


def bart_forward(params, input_ids, attention_mask, labels):
    B, S = input_ids.shape
    T = labels.shape[1]

    # TODO(synk): embedding-table gathers stay in XLA (dynamic row gather has no
    # cheap tiny-kernel equivalent at these dims).
    enc_x0 = params["shared_emb"][input_ids] + params["enc_pos"][POS_OFFSET:POS_OFFSET + S]
    dec_ids = shift_tokens_right(labels)
    dec_x0 = params["shared_emb"][dec_ids] + params["dec_pos"][POS_OFFSET:POS_OFFSET + T]

    mask3 = attention_mask.astype(jnp.float32).reshape(B, 1, S)
    lab3 = labels.astype(jnp.int32).reshape(B, T, 1)

    enc_out = run_encoder(enc_x0, mask3, params)
    logits, nll = run_decoder(dec_x0, enc_out, mask3, lab3, params)

    valid = (labels != -100).astype(jnp.float32)
    loss = jnp.sum(nll[..., 0]) / jnp.maximum(jnp.sum(valid), 1.0)
    return loss, logits


# ---------------- deterministic parameter init (packed layout) ----------------
def init_params(key):
    keys = iter(jax.random.split(key, 512))

    def nrm(shape, scale=0.02):
        return (scale * jax.random.normal(next(keys), shape)).astype(jnp.float32)

    def zeros(shape):
        return jnp.zeros(shape, jnp.float32)

    def ones(shape):
        return jnp.ones(shape, jnp.float32)

    def enc_layer():
        return dict(
            wqkv=nrm((D_MODEL, 3 * D_MODEL)), bqkv=zeros((1, 3 * D_MODEL)),
            wo=nrm((D_MODEL, D_MODEL)), bo=zeros((1, D_MODEL)),
            g_sa=ones((1, D_MODEL)), b_sa=zeros((1, D_MODEL)),
            w1=nrm((D_MODEL, D_FF)), b1=zeros((1, D_FF)),
            w2=nrm((D_FF, D_MODEL)), b2=zeros((1, D_MODEL)),
            g_ff=ones((1, D_MODEL)), b_ff=zeros((1, D_MODEL)))

    def dec_layer():
        d = enc_layer()
        d.update(dict(
            c_wq=nrm((D_MODEL, D_MODEL)), c_bq=zeros((1, D_MODEL)),
            c_wkv=nrm((D_MODEL, 2 * D_MODEL)), c_bkv=zeros((1, 2 * D_MODEL)),
            c_wo=nrm((D_MODEL, D_MODEL)), c_bo=zeros((1, D_MODEL)),
            g_ca=ones((1, D_MODEL)), b_ca=zeros((1, D_MODEL))))
        return d

    def stack(layers):
        return jax.tree_util.tree_map(lambda *xs: jnp.stack(xs, axis=0), *layers)

    return {
        "shared_emb": nrm((VOCAB, D_MODEL)),
        "enc_pos": nrm((MAX_POS, D_MODEL)),
        "dec_pos": nrm((MAX_POS, D_MODEL)),
        "enc_ln_emb_g": ones((1, D_MODEL)), "enc_ln_emb_b": zeros((1, D_MODEL)),
        "dec_ln_emb_g": ones((1, D_MODEL)), "dec_ln_emb_b": zeros((1, D_MODEL)),
        "final_logits_bias": zeros((1, VOCAB)),
        "enc": stack([enc_layer() for _ in range(N_ENC_LAYERS)]),
        "dec": stack([dec_layer() for _ in range(N_DEC_LAYERS)]),
    }


# ---------------- main ----------------
if __name__ == "__main__":
    key = jax.random.PRNGKey(0)
    pkey, ikey, lkey = jax.random.split(key, 3)
    params = init_params(pkey)

    B, S, T = 2, 8, 8
    input_ids = jax.random.randint(ikey, (B, S), 3, VOCAB).astype(jnp.int32)
    labels = jax.random.randint(lkey, (B, T), 3, VOCAB).astype(jnp.int32)

    # pad the tail of the second source sequence (tokenizer padding semantics)
    attention_mask = jnp.ones((B, S), jnp.float32).at[1, S - 2:].set(0.0)
    input_ids = input_ids.at[1, S - 2:].set(PAD_ID)

    fwd = jax.jit(functools.partial(bart_forward, params))
    loss, logits = fwd(input_ids, attention_mask, labels)
    jax.block_until_ready((loss, logits))

    assert logits.shape == (B, T, VOCAB), logits.shape
    assert logits.dtype == jnp.float32
    assert bool(jnp.isfinite(loss)) and bool(jnp.all(jnp.isfinite(logits)))
    print("KERNEL_OK")
</pallas_src>

<mosaic_0001>
module attributes {stable_mosaic.version = 11 : i64} {
  func.func @_encoder_kernel(%arg0: i32, %arg1: memref<1x8x32xf32, #tpu.memory_space<vmem>>, %arg2: memref<1x1x8xf32, #tpu.memory_space<vmem>>, %arg3: memref<1x32xf32, #tpu.memory_space<vmem>>, %arg4: memref<1x32xf32, #tpu.memory_space<vmem>>, %arg5: memref<1x32x96xf32, #tpu.memory_space<vmem>>, %arg6: memref<1x1x96xf32, #tpu.memory_space<vmem>>, %arg7: memref<1x32x32xf32, #tpu.memory_space<vmem>>, %arg8: memref<1x1x32xf32, #tpu.memory_space<vmem>>, %arg9: memref<1x1x32xf32, #tpu.memory_space<vmem>>, %arg10: memref<1x1x32xf32, #tpu.memory_space<vmem>>, %arg11: memref<1x32x64xf32, #tpu.memory_space<vmem>>, %arg12: memref<1x1x64xf32, #tpu.memory_space<vmem>>, %arg13: memref<1x64x32xf32, #tpu.memory_space<vmem>>, %arg14: memref<1x1x32xf32, #tpu.memory_space<vmem>>, %arg15: memref<1x1x32xf32, #tpu.memory_space<vmem>>, %arg16: memref<1x1x32xf32, #tpu.memory_space<vmem>>, %arg17: memref<1x8x32xf32, #tpu.memory_space<vmem>>) attributes {dimension_semantics = [#tpu.dimension_semantics<parallel>], iteration_bounds = array<i64: 2>, scalar_prefetch = 0 : i64, scratch_operands = 0 : i64, tpu.core_type = #tpu.core_type<tc>, window_params = [{transform_indices = @transform_0, window_bounds = array<i64: 1, 8, 32>}, {transform_indices = @transform_1, window_bounds = array<i64: 1, 1, 8>}, {pipeline_mode = #tpu.pipeline_mode<synchronous>, transform_indices = @transform_2, window_bounds = array<i64: 1, 32>}, {pipeline_mode = #tpu.pipeline_mode<synchronous>, transform_indices = @transform_3, window_bounds = array<i64: 1, 32>}, {pipeline_mode = #tpu.pipeline_mode<synchronous>, transform_indices = @transform_4, window_bounds = array<i64: 1, 32, 96>}, {pipeline_mode = #tpu.pipeline_mode<synchronous>, transform_indices = @transform_5, window_bounds = array<i64: 1, 1, 96>}, {pipeline_mode = #tpu.pipeline_mode<synchronous>, transform_indices = @transform_6, window_bounds = array<i64: 1, 32, 32>}, {pipeline_mode = #tpu.pipeline_mode<synchronous>, transform_indices = @transform_7, window_bounds = array<i64: 1, 1, 32>}, {pipeline_mode = #tpu.pipeline_mode<synchronous>, transform_indices = @transform_8, window_bounds = array<i64: 1, 1, 32>}, {pipeline_mode = #tpu.pipeline_mode<synchronous>, transform_indices = @transform_9, window_bounds = array<i64: 1, 1, 32>}, {pipeline_mode = #tpu.pipeline_mode<synchronous>, transform_indices = @transform_10, window_bounds = array<i64: 1, 32, 64>}, {pipeline_mode = #tpu.pipeline_mode<synchronous>, transform_indices = @transform_11, window_bounds = array<i64: 1, 1, 64>}, {pipeline_mode = #tpu.pipeline_mode<synchronous>, transform_indices = @transform_12, window_bounds = array<i64: 1, 64, 32>}, {pipeline_mode = #tpu.pipeline_mode<synchronous>, transform_indices = @transform_13, window_bounds = array<i64: 1, 1, 32>}, {pipeline_mode = #tpu.pipeline_mode<synchronous>, transform_indices = @transform_14, window_bounds = array<i64: 1, 1, 32>}, {pipeline_mode = #tpu.pipeline_mode<synchronous>, transform_indices = @transform_15, window_bounds = array<i64: 1, 1, 32>}, {transform_indices = @transform_16, window_bounds = array<i64: 1, 8, 32>}]} {
    %c0 = arith.constant 0 : index
    %c0_0 = arith.constant 0 : index
    %c0_1 = arith.constant 0 : index
    %0 = vector.load %arg1[%c0, %c0_0, %c0_1] : memref<1x8x32xf32, #tpu.memory_space<vmem>>, vector<1x8x32xf32>
    %1 = vector.shape_cast %0 : vector<1x8x32xf32> to vector<8x32xf32>
    %c0_2 = arith.constant 0 : index
    %c0_3 = arith.constant 0 : index
    %c0_4 = arith.constant 0 : index
    %2 = vector.load %arg2[%c0_2, %c0_3, %c0_4] : memref<1x1x8xf32, #tpu.memory_space<vmem>>, vector<1x1x8xf32>
    %3 = vector.shape_cast %2 : vector<1x1x8xf32> to vector<1x8xf32>
    %cst = arith.constant 1.000000e+00 : f32
    %4 = vector.broadcast %cst : f32 to vector<1x8xf32>
    %5 = arith.subf %4, %3 : vector<1x8xf32>
    %cst_5 = arith.constant -1.000000e+09 : f32
    %6 = vector.broadcast %cst_5 : f32 to vector<1x8xf32>
    %7 = arith.mulf %5, %6 : vector<1x8xf32>
    %c0_6 = arith.constant 0 : index
    %c0_7 = arith.constant 0 : index
    %8 = vector.load %arg3[%c0_6, %c0_7] : memref<1x32xf32, #tpu.memory_space<vmem>>, vector<1x32xf32>
    %c0_8 = arith.constant 0 : index
    %c0_9 = arith.constant 0 : index
    %9 = vector.load %arg4[%c0_8, %c0_9] : memref<1x32xf32, #tpu.memory_space<vmem>>, vector<1x32xf32>
    %cst_10 = arith.constant dense<0.000000e+00> : vector<8xf32>
    %10 = vector.multi_reduction <add>, %1, %cst_10 [1] : vector<8x32xf32> to vector<8xf32>
    %11 = vector.shape_cast %10 : vector<8xf32> to vector<8x1xf32>
    %cst_11 = arith.constant 3.200000e+01 : f32
    %12 = vector.broadcast %cst_11 : f32 to vector<8x1xf32>
    %13 = arith.divf %11, %12 : vector<8x1xf32>
    %14 = vector.broadcast %13 : vector<8x1xf32> to vector<8x32xf32>
    %15 = arith.subf %1, %14 : vector<8x32xf32>
    %16 = arith.mulf %15, %15 : vector<8x32xf32>
    %cst_12 = arith.constant dense<0.000000e+00> : vector<8xf32>
    %17 = vector.multi_reduction <add>, %16, %cst_12 [1] : vector<8x32xf32> to vector<8xf32>
    %18 = vector.shape_cast %17 : vector<8xf32> to vector<8x1xf32>
    %cst_13 = arith.constant 3.200000e+01 : f32
    %19 = vector.broadcast %cst_13 : f32 to vector<8x1xf32>
    %20 = arith.divf %18, %19 : vector<8x1xf32>
    %21 = vector.broadcast %13 : vector<8x1xf32> to vector<8x32xf32>
    %22 = arith.subf %1, %21 : vector<8x32xf32>
    %cst_14 = arith.constant 9.99999974E-6 : f32
    %23 = vector.broadcast %cst_14 : f32 to vector<8x1xf32>
    %24 = arith.addf %20, %23 : vector<8x1xf32>
    %25 = math.rsqrt %24 : vector<8x1xf32>
    %26 = vector.broadcast %25 : vector<8x1xf32> to vector<8x32xf32>
    %27 = arith.mulf %22, %26 : vector<8x32xf32>
    %28 = vector.broadcast %8 : vector<1x32xf32> to vector<8x32xf32>
    %29 = arith.mulf %27, %28 : vector<8x32xf32>
    %30 = vector.broadcast %9 : vector<1x32xf32> to vector<8x32xf32>
    %31 = arith.addf %29, %30 : vector<8x32xf32>
    %c0_15 = arith.constant 0 : index
    %c0_16 = arith.constant 0 : index
    %c0_17 = arith.constant 0 : index
    %32 = vector.load %arg5[%c0_15, %c0_16, %c0_17] : memref<1x32x96xf32, #tpu.memory_space<vmem>>, vector<1x32x96xf32>
    %33 = vector.shape_cast %32 : vector<1x32x96xf32> to vector<32x96xf32>
    %cst_18 = arith.constant dense<0.000000e+00> : vector<8x96xf32>
    %34 = tpu.matmul %31, %33, %cst_18 {dimension_numbers = #tpu.dot_dimension_numbers<[1], [0], [0], [1], [0, 0, 1, 1], [], []>} : vector<8x32xf32>, vector<32x96xf32>, vector<8x96xf32> -> vector<8x96xf32>
    %c0_19 = arith.constant 0 : index
    %c0_20 = arith.constant 0 : index
    %c0_21 = arith.constant 0 : index
    %35 = vector.load %arg6[%c0_19, %c0_20, %c0_21] : memref<1x1x96xf32, #tpu.memory_space<vmem>>, vector<1x1x96xf32>
    %36 = vector.shape_cast %35 : vector<1x1x96xf32> to vector<1x96xf32>
    %37 = vector.broadcast %36 : vector<1x96xf32> to vector<8x96xf32>
    %38 = arith.addf %34, %37 : vector<8x96xf32>
    %39 = vector.extract_strided_slice %38 {offsets = [0, 0], sizes = [8, 32], strides = [1, 1]} : vector<8x96xf32> to vector<8x32xf32>
    %40 = vector.extract_strided_slice %38 {offsets = [0, 32], sizes = [8, 32], strides = [1, 1]} : vector<8x96xf32> to vector<8x32xf32>
    %41 = vector.extract_strided_slice %38 {offsets = [0, 64], sizes = [8, 32], strides = [1, 1]} : vector<8x96xf32> to vector<8x32xf32>
    %c0_22 = arith.constant 0 : index
    %c0_23 = arith.constant 0 : index
    %c0_24 = arith.constant 0 : index
    %42 = vector.load %arg7[%c0_22, %c0_23, %c0_24] : memref<1x32x32xf32, #tpu.memory_space<vmem>>, vector<1x32x32xf32>
    %43 = vector.shape_cast %42 : vector<1x32x32xf32> to vector<32x32xf32>
    %c0_25 = arith.constant 0 : index
    %c0_26 = arith.constant 0 : index
    %c0_27 = arith.constant 0 : index
    %44 = vector.load %arg8[%c0_25, %c0_26, %c0_27] : memref<1x1x32xf32, #tpu.memory_space<vmem>>, vector<1x1x32xf32>
    %45 = vector.shape_cast %44 : vector<1x1x32xf32> to vector<1x32xf32>
    %cst_28 = arith.constant 0.000000e+00 : f32
    %46 = vector.broadcast %cst_28 : f32 to vector<8x32xf32>
    %47 = vector.extract_strided_slice %39 {offsets = [0, 0], sizes = [8, 16], strides = [1, 1]} : vector<8x32xf32> to vector<8x16xf32>
    %cst_29 = arith.constant 2.500000e-01 : f32
    %48 = vector.broadcast %cst_29 : f32 to vector<8x16xf32>
    %49 = arith.mulf %47, %48 : vector<8x16xf32>
    %50 = vector.extract_strided_slice %40 {offsets = [0, 0], sizes = [8, 16], strides = [1, 1]} : vector<8x32xf32> to vector<8x16xf32>
    %51 = tpu.transpose %50, [1, 0] : vector<8x16xf32> -> vector<16x8xf32>
    %cst_30 = arith.constant dense<0.000000e+00> : vector<8x8xf32>
    %52 = tpu.matmul %49, %51, %cst_30 {dimension_numbers = #tpu.dot_dimension_numbers<[1], [0], [0], [1], [0, 0, 1, 1], [], []>} : vector<8x16xf32>, vector<16x8xf32>, vector<8x8xf32> -> vector<8x8xf32>
    %53 = vector.broadcast %7 : vector<1x8xf32> to vector<8x8xf32>
    %54 = arith.addf %52, %53 : vector<8x8xf32>
    %cst_31 = arith.constant dense<0xFF800000> : vector<8xf32>
    %55 = vector.multi_reduction <maximumf>, %54, %cst_31 [1] : vector<8x8xf32> to vector<8xf32>
    %56 = vector.shape_cast %55 : vector<8xf32> to vector<8x1xf32>
    %57 = vector.broadcast %56 : vector<8x1xf32> to vector<8x8xf32>
    %58 = arith.subf %54, %57 : vector<8x8xf32>
    %59 = math.exp %58 : vector<8x8xf32>
    %cst_32 = arith.constant dense<0.000000e+00> : vector<8xf32>
    %60 = vector.multi_reduction <add>, %59, %cst_32 [1] : vector<8x8xf32> to vector<8xf32>
    %61 = vector.shape_cast %60 : vector<8xf32> to vector<8x1xf32>
    %62 = vector.extract_strided_slice %41 {offsets = [0, 0], sizes = [8, 16], strides = [1, 1]} : vector<8x32xf32> to vector<8x16xf32>
    %cst_33 = arith.constant dense<0.000000e+00> : vector<8x16xf32>
    %63 = tpu.matmul %59, %62, %cst_33 {dimension_numbers = #tpu.dot_dimension_numbers<[1], [0], [0], [1], [0, 0, 1, 1], [], []>} : vector<8x8xf32>, vector<8x16xf32>, vector<8x16xf32> -> vector<8x16xf32>
    %64 = tpu.reciprocal %61 {approx = true} : vector<8x1xf32> -> vector<8x1xf32>
    %65 = vector.broadcast %64 : vector<8x1xf32> to vector<8x16xf32>
    %66 = arith.mulf %63, %65 : vector<8x16xf32>
    %67 = vector.extract_strided_slice %43 {offsets = [0, 0], sizes = [16, 32], strides = [1, 1]} : vector<32x32xf32> to vector<16x32xf32>
    %cst_34 = arith.constant dense<0.000000e+00> : vector<8x32xf32>
    %68 = tpu.matmul %66, %67, %cst_34 {dimension_numbers = #tpu.dot_dimension_numbers<[1], [0], [0], [1], [0, 0, 1, 1], [], []>} : vector<8x16xf32>, vector<16x32xf32>, vector<8x32xf32> -> vector<8x32xf32>
    %69 = arith.addf %46, %68 : vector<8x32xf32>
    %70 = vector.extract_strided_slice %39 {offsets = [0, 16], sizes = [8, 16], strides = [1, 1]} : vector<8x32xf32> to vector<8x16xf32>
    %cst_35 = arith.constant 2.500000e-01 : f32
    %71 = vector.broadcast %cst_35 : f32 to vector<8x16xf32>
    %72 = arith.mulf %70, %71 : vector<8x16xf32>
    %73 = vector.extract_strided_slice %40 {offsets = [0, 16], sizes = [8, 16], strides = [1, 1]} : vector<8x32xf32> to vector<8x16xf32>
    %74 = tpu.transpose %73, [1, 0] : vector<8x16xf32> -> vector<16x8xf32>
    %cst_36 = arith.constant dense<0.000000e+00> : vector<8x8xf32>
    %75 = tpu.matmul %72, %74, %cst_36 {dimension_numbers = #tpu.dot_dimension_numbers<[1], [0], [0], [1], [0, 0, 1, 1], [], []>} : vector<8x16xf32>, vector<16x8xf32>, vector<8x8xf32> -> vector<8x8xf32>
    %76 = vector.broadcast %7 : vector<1x8xf32> to vector<8x8xf32>
    %77 = arith.addf %75, %76 : vector<8x8xf32>
    %cst_37 = arith.constant dense<0xFF800000> : vector<8xf32>
    %78 = vector.multi_reduction <maximumf>, %77, %cst_37 [1] : vector<8x8xf32> to vector<8xf32>
    %79 = vector.shape_cast %78 : vector<8xf32> to vector<8x1xf32>
    %80 = vector.broadcast %79 : vector<8x1xf32> to vector<8x8xf32>
    %81 = arith.subf %77, %80 : vector<8x8xf32>
    %82 = math.exp %81 : vector<8x8xf32>
    %cst_38 = arith.constant dense<0.000000e+00> : vector<8xf32>
    %83 = vector.multi_reduction <add>, %82, %cst_38 [1] : vector<8x8xf32> to vector<8xf32>
    %84 = vector.shape_cast %83 : vector<8xf32> to vector<8x1xf32>
    %85 = vector.extract_strided_slice %41 {offsets = [0, 16], sizes = [8, 16], strides = [1, 1]} : vector<8x32xf32> to vector<8x16xf32>
    %cst_39 = arith.constant dense<0.000000e+00> : vector<8x16xf32>
    %86 = tpu.matmul %82, %85, %cst_39 {dimension_numbers = #tpu.dot_dimension_numbers<[1], [0], [0], [1], [0, 0, 1, 1], [], []>} : vector<8x8xf32>, vector<8x16xf32>, vector<8x16xf32> -> vector<8x16xf32>
    %87 = tpu.reciprocal %84 {approx = true} : vector<8x1xf32> -> vector<8x1xf32>
    %88 = vector.broadcast %87 : vector<8x1xf32> to vector<8x16xf32>
    %89 = arith.mulf %86, %88 : vector<8x16xf32>
    %90 = vector.extract_strided_slice %43 {offsets = [16, 0], sizes = [16, 32], strides = [1, 1]} : vector<32x32xf32> to vector<16x32xf32>
    %cst_40 = arith.constant dense<0.000000e+00> : vector<8x32xf32>
    %91 = tpu.matmul %89, %90, %cst_40 {dimension_numbers = #tpu.dot_dimension_numbers<[1], [0], [0], [1], [0, 0, 1, 1], [], []>} : vector<8x16xf32>, vector<16x32xf32>, vector<8x32xf32> -> vector<8x32xf32>
    %92 = arith.addf %69, %91 : vector<8x32xf32>
    %93 = vector.broadcast %45 : vector<1x32xf32> to vector<8x32xf32>
    %94 = arith.addf %92, %93 : vector<8x32xf32>
    %95 = arith.addf %31, %94 : vector<8x32xf32>
    %c0_41 = arith.constant 0 : index
    %c0_42 = arith.constant 0 : index
    %c0_43 = arith.constant 0 : index
    %96 = vector.load %arg9[%c0_41, %c0_42, %c0_43] : memref<1x1x32xf32, #tpu.memory_space<vmem>>, vector<1x1x32xf32>
    %97 = vector.shape_cast %96 : vector<1x1x32xf32> to vector<1x32xf32>
    %c0_44 = arith.constant 0 : index
    %c0_45 = arith.constant 0 : index
    %c0_46 = arith.constant 0 : index
    %98 = vector.load %arg10[%c0_44, %c0_45, %c0_46] : memref<1x1x32xf32, #tpu.memory_space<vmem>>, vector<1x1x32xf32>
    %99 = vector.shape_cast %98 : vector<1x1x32xf32> to vector<1x32xf32>
    %cst_47 = arith.constant dense<0.000000e+00> : vector<8xf32>
    %100 = vector.multi_reduction <add>, %95, %cst_47 [1] : vector<8x32xf32> to vector<8xf32>
    %101 = vector.shape_cast %100 : vector<8xf32> to vector<8x1xf32>
    %cst_48 = arith.constant 3.200000e+01 : f32
    %102 = vector.broadcast %cst_48 : f32 to vector<8x1xf32>
    %103 = arith.divf %101, %102 : vector<8x1xf32>
    %104 = vector.broadcast %103 : vector<8x1xf32> to vector<8x32xf32>
    %105 = arith.subf %95, %104 : vector<8x32xf32>
    %106 = arith.mulf %105, %105 : vector<8x32xf32>
    %cst_49 = arith.constant dense<0.000000e+00> : vector<8xf32>
    %107 = vector.multi_reduction <add>, %106, %cst_49 [1] : vector<8x32xf32> to vector<8xf32>
    %108 = vector.shape_cast %107 : vector<8xf32> to vector<8x1xf32>
    %cst_50 = arith.constant 3.200000e+01 : f32
    %109 = vector.broadcast %cst_50 : f32 to vector<8x1xf32>
    %110 = arith.divf %108, %109 : vector<8x1xf32>
    %111 = vector.broadcast %103 : vector<8x1xf32> to vector<8x32xf32>
    %112 = arith.subf %95, %111 : vector<8x32xf32>
    %cst_51 = arith.constant 9.99999974E-6 : f32
    %113 = vector.broadcast %cst_51 : f32 to vector<8x1xf32>
    %114 = arith.addf %110, %113 : vector<8x1xf32>
    %115 = math.rsqrt %114 : vector<8x1xf32>
    %116 = vector.broadcast %115 : vector<8x1xf32> to vector<8x32xf32>
    %117 = arith.mulf %112, %116 : vector<8x32xf32>
    %118 = vector.broadcast %97 : vector<1x32xf32> to vector<8x32xf32>
    %119 = arith.mulf %117, %118 : vector<8x32xf32>
    %120 = vector.broadcast %99 : vector<1x32xf32> to vector<8x32xf32>
    %121 = arith.addf %119, %120 : vector<8x32xf32>
    %c0_52 = arith.constant 0 : index
    %c0_53 = arith.constant 0 : index
    %c0_54 = arith.constant 0 : index
    %122 = vector.load %arg11[%c0_52, %c0_53, %c0_54] : memref<1x32x64xf32, #tpu.memory_space<vmem>>, vector<1x32x64xf32>
    %123 = vector.shape_cast %122 : vector<1x32x64xf32> to vector<32x64xf32>
    %c0_55 = arith.constant 0 : index
    %c0_56 = arith.constant 0 : index
    %c0_57 = arith.constant 0 : index
    %124 = vector.load %arg12[%c0_55, %c0_56, %c0_57] : memref<1x1x64xf32, #tpu.memory_space<vmem>>, vector<1x1x64xf32>
    %125 = vector.shape_cast %124 : vector<1x1x64xf32> to vector<1x64xf32>
    %c0_58 = arith.constant 0 : index
    %c0_59 = arith.constant 0 : index
    %c0_60 = arith.constant 0 : index
    %126 = vector.load %arg13[%c0_58, %c0_59, %c0_60] : memref<1x64x32xf32, #tpu.memory_space<vmem>>, vector<1x64x32xf32>
    %127 = vector.shape_cast %126 : vector<1x64x32xf32> to vector<64x32xf32>
    %c0_61 = arith.constant 0 : index
    %c0_62 = arith.constant 0 : index
    %c0_63 = arith.constant 0 : index
    %128 = vector.load %arg14[%c0_61, %c0_62, %c0_63] : memref<1x1x32xf32, #tpu.memory_space<vmem>>, vector<1x1x32xf32>
    %129 = vector.shape_cast %128 : vector<1x1x32xf32> to vector<1x32xf32>
    %cst_64 = arith.constant dense<0.000000e+00> : vector<8x64xf32>
    %130 = tpu.matmul %121, %123, %cst_64 {dimension_numbers = #tpu.dot_dimension_numbers<[1], [0], [0], [1], [0, 0, 1, 1], [], []>} : vector<8x32xf32>, vector<32x64xf32>, vector<8x64xf32> -> vector<8x64xf32>
    %131 = vector.broadcast %125 : vector<1x64xf32> to vector<8x64xf32>
    %132 = arith.addf %130, %131 : vector<8x64xf32>
    %133 = arith.mulf %132, %132 : vector<8x64xf32>
    %134 = arith.mulf %132, %133 : vector<8x64xf32>
    %cst_65 = arith.constant 4.471500e-02 : f32
    %135 = vector.broadcast %cst_65 : f32 to vector<8x64xf32>
    %136 = arith.mulf %135, %134 : vector<8x64xf32>
    %137 = arith.addf %132, %136 : vector<8x64xf32>
    %cst_66 = arith.constant 0.797884583 : f32
    %138 = vector.broadcast %cst_66 : f32 to vector<8x64xf32>
    %139 = arith.mulf %138, %137 : vector<8x64xf32>
    %140 = math.tanh %139 : vector<8x64xf32>
    %cst_67 = arith.constant 1.000000e+00 : f32
    %141 = vector.broadcast %cst_67 : f32 to vector<8x64xf32>
    %142 = arith.addf %141, %140 : vector<8x64xf32>
    %cst_68 = arith.constant 5.000000e-01 : f32
    %143 = vector.broadcast %cst_68 : f32 to vector<8x64xf32>
    %144 = arith.mulf %143, %142 : vector<8x64xf32>
    %145 = arith.mulf %132, %144 : vector<8x64xf32>
    %cst_69 = arith.constant dense<0.000000e+00> : vector<8x32xf32>
    %146 = tpu.matmul %145, %127, %cst_69 {dimension_numbers = #tpu.dot_dimension_numbers<[1], [0], [0], [1], [0, 0, 1, 1], [], []>} : vector<8x64xf32>, vector<64x32xf32>, vector<8x32xf32> -> vector<8x32xf32>
    %147 = vector.broadcast %129 : vector<1x32xf32> to vector<8x32xf32>
    %148 = arith.addf %146, %147 : vector<8x32xf32>
    %149 = arith.addf %121, %148 : vector<8x32xf32>
    %c0_70 = arith.constant 0 : index
    %c0_71 = arith.constant 0 : index
    %c0_72 = arith.constant 0 : index
    %150 = vector.load %arg15[%c0_70, %c0_71, %c0_72] : memref<1x1x32xf32, #tpu.memory_space<vmem>>, vector<1x1x32xf32>
    %151 = vector.shape_cast %150 : vector<1x1x32xf32> to vector<1x32xf32>
    %c0_73 = arith.constant 0 : index
    %c0_74 = arith.constant 0 : index
    %c0_75 = arith.constant 0 : index
    %152 = vector.load %arg16[%c0_73, %c0_74, %c0_75] : memref<1x1x32xf32, #tpu.memory_space<vmem>>, vector<1x1x32xf32>
    %153 = vector.shape_cast %152 : vector<1x1x32xf32> to vector<1x32xf32>
    %cst_76 = arith.constant dense<0.000000e+00> : vector<8xf32>
    %154 = vector.multi_reduction <add>, %149, %cst_76 [1] : vector<8x32xf32> to vector<8xf32>
    %155 = vector.shape_cast %154 : vector<8xf32> to vector<8x1xf32>
    %cst_77 = arith.constant 3.200000e+01 : f32
    %156 = vector.broadcast %cst_77 : f32 to vector<8x1xf32>
    %157 = arith.divf %155, %156 : vector<8x1xf32>
    %158 = vector.broadcast %157 : vector<8x1xf32> to vector<8x32xf32>
    %159 = arith.subf %149, %158 : vector<8x32xf32>
    %160 = arith.mulf %159, %159 : vector<8x32xf32>
    %cst_78 = arith.constant dense<0.000000e+00> : vector<8xf32>
    %161 = vector.multi_reduction <add>, %160, %cst_78 [1] : vector<8x32xf32> to vector<8xf32>
    %162 = vector.shape_cast %161 : vector<8xf32> to vector<8x1xf32>
    %cst_79 = arith.constant 3.200000e+01 : f32
    %163 = vector.broadcast %cst_79 : f32 to vector<8x1xf32>
    %164 = arith.divf %162, %163 : vector<8x1xf32>
    %165 = vector.broadcast %157 : vector<8x1xf32> to vector<8x32xf32>
    %166 = arith.subf %149, %165 : vector<8x32xf32>
    %cst_80 = arith.constant 9.99999974E-6 : f32
    %167 = vector.broadcast %cst_80 : f32 to vector<8x1xf32>
    %168 = arith.addf %164, %167 : vector<8x1xf32>
    %169 = math.rsqrt %168 : vector<8x1xf32>
    %170 = vector.broadcast %169 : vector<8x1xf32> to vector<8x32xf32>
    %171 = arith.mulf %166, %170 : vector<8x32xf32>
    %172 = vector.broadcast %151 : vector<1x32xf32> to vector<8x32xf32>
    %173 = arith.mulf %171, %172 : vector<8x32xf32>
    %174 = vector.broadcast %153 : vector<1x32xf32> to vector<8x32xf32>
    %175 = arith.addf %173, %174 : vector<8x32xf32>
    %c0_81 = arith.constant 0 : index
    %c0_82 = arith.constant 0 : index
    %c0_83 = arith.constant 0 : index
    %176 = vector.load %arg17[%c0_81, %c0_82, %c0_83] : memref<1x8x32xf32, #tpu.memory_space<vmem>>, vector<1x8x32xf32>
    %177 = vector.shape_cast %176 : vector<1x8x32xf32> to vector<8x32xf32>
    %178 = vector.shape_cast %175 : vector<8x32xf32> to vector<1x8x32xf32>
    tpu.vector_store %arg17[%c0_81, %c0_82, %c0_83], %178 {strides = array<i32>} : memref<1x8x32xf32, #tpu.memory_space<vmem>>, vector<1x8x32xf32>,
    return
  }
  func.func @transform_0(%arg0: i32) -> (i32, i32, i32) {
    %c0_i32 = arith.constant 0 : i32
    %c0_i32_0 = arith.constant 0 : i32
    %c0_i32_1 = arith.constant 0 : i32
    return %arg0, %c0_i32, %c0_i32_0 : i32, i32, i32
  }
  func.func @transform_1(%arg0: i32) -> (i32, i32, i32) {
    %c0_i32 = arith.constant 0 : i32
    %c0_i32_0 = arith.constant 0 : i32
    %c0_i32_1 = arith.constant 0 : i32
    return %arg0, %c0_i32, %c0_i32_0 : i32, i32, i32
  }
  func.func @transform_2(%arg0: i32) -> (i32, i32) {
    %c0_i32 = arith.constant 0 : i32
    %c0_i32_0 = arith.constant 0 : i32
    %c0_i32_1 = arith.constant 0 : i32
    return %c0_i32, %c0_i32_0 : i32, i32
  }
  func.func @transform_3(%arg0: i32) -> (i32, i32) {
    %c0_i32 = arith.constant 0 : i32
    %c0_i32_0 = arith.constant 0 : i32
    %c0_i32_1 = arith.constant 0 : i32
    return %c0_i32, %c0_i32_0 : i32, i32
  }
  func.func @transform_4(%arg0: i32) -> (i32, i32, i32) {
    %c0_i32 = arith.constant 0 : i32
    %c0_i32_0 = arith.constant 0 : i32
    %c0_i32_1 = arith.constant 0 : i32
    %c0_i32_2 = arith.constant 0 : i32
    return %c0_i32, %c0_i32_0, %c0_i32_1 : i32, i32, i32
  }
  func.func @transform_5(%arg0: i32) -> (i32, i32, i32) {
    %c0_i32 = arith.constant 0 : i32
    %c0_i32_0 = arith.constant 0 : i32
    %c0_i32_1 = arith.constant 0 : i32
    %c0_i32_2 = arith.constant 0 : i32
    return %c0_i32, %c0_i32_0, %c0_i32_1 : i32, i32, i32
  }
  func.func @transform_6(%arg0: i32) -> (i32, i32, i32) {
    %c0_i32 = arith.constant 0 : i32
    %c0_i32_0 = arith.constant 0 : i32
    %c0_i32_1 = arith.constant 0 : i32
    %c0_i32_2 = arith.constant 0 : i32
    return %c0_i32, %c0_i32_0, %c0_i32_1 : i32, i32, i32
  }
  func.func @transform_7(%arg0: i32) -> (i32, i32, i32) {
    %c0_i32 = arith.constant 0 : i32
    %c0_i32_0 = arith.constant 0 : i32
    %c0_i32_1 = arith.constant 0 : i32
    %c0_i32_2 = arith.constant 0 : i32
    return %c0_i32, %c0_i32_0, %c0_i32_1 : i32, i32, i32
  }
  func.func @transform_8(%arg0: i32) -> (i32, i32, i32) {
    %c0_i32 = arith.constant 0 : i32
    %c0_i32_0 = arith.constant 0 : i32
    %c0_i32_1 = arith.constant 0 : i32
    %c0_i32_2 = arith.constant 0 : i32
    return %c0_i32, %c0_i32_0, %c0_i32_1 : i32, i32, i32
  }
  func.func @transform_9(%arg0: i32) -> (i32, i32, i32) {
    %c0_i32 = arith.constant 0 : i32
    %c0_i32_0 = arith.constant 0 : i32
    %c0_i32_1 = arith.constant 0 : i32
    %c0_i32_2 = arith.constant 0 : i32
    return %c0_i32, %c0_i32_0, %c0_i32_1 : i32, i32, i32
  }
  func.func @transform_10(%arg0: i32) -> (i32, i32, i32) {
    %c0_i32 = arith.constant 0 : i32
    %c0_i32_0 = arith.constant 0 : i32
    %c0_i32_1 = arith.constant 0 : i32
    %c0_i32_2 = arith.constant 0 : i32
    return %c0_i32, %c0_i32_0, %c0_i32_1 : i32, i32, i32
  }
  func.func @transform_11(%arg0: i32) -> (i32, i32, i32) {
    %c0_i32 = arith.constant 0 : i32
    %c0_i32_0 = arith.constant 0 : i32
    %c0_i32_1 = arith.constant 0 : i32
    %c0_i32_2 = arith.constant 0 : i32
    return %c0_i32, %c0_i32_0, %c0_i32_1 : i32, i32, i32
  }
  func.func @transform_12(%arg0: i32) -> (i32, i32, i32) {
    %c0_i32 = arith.constant 0 : i32
    %c0_i32_0 = arith.constant 0 : i32
    %c0_i32_1 = arith.constant 0 : i32
    %c0_i32_2 = arith.constant 0 : i32
    return %c0_i32, %c0_i32_0, %c0_i32_1 : i32, i32, i32
  }
  func.func @transform_13(%arg0: i32) -> (i32, i32, i32) {
    %c0_i32 = arith.constant 0 : i32
    %c0_i32_0 = arith.constant 0 : i32
    %c0_i32_1 = arith.constant 0 : i32
    %c0_i32_2 = arith.constant 0 : i32
    return %c0_i32, %c0_i32_0, %c0_i32_1 : i32, i32, i32
  }
  func.func @transform_14(%arg0: i32) -> (i32, i32, i32) {
    %c0_i32 = arith.constant 0 : i32
    %c0_i32_0 = arith.constant 0 : i32
    %c0_i32_1 = arith.constant 0 : i32
    %c0_i32_2 = arith.constant 0 : i32
    return %c0_i32, %c0_i32_0, %c0_i32_1 : i32, i32, i32
  }
  func.func @transform_15(%arg0: i32) -> (i32, i32, i32) {
    %c0_i32 = arith.constant 0 : i32
    %c0_i32_0 = arith.constant 0 : i32
    %c0_i32_1 = arith.constant 0 : i32
    %c0_i32_2 = arith.constant 0 : i32
    return %c0_i32, %c0_i32_0, %c0_i32_1 : i32, i32, i32
  }
  func.func @transform_16(%arg0: i32) -> (i32, i32, i32) {
    %c0_i32 = arith.constant 0 : i32
    %c0_i32_0 = arith.constant 0 : i32
    %c0_i32_1 = arith.constant 0 : i32
    return %arg0, %c0_i32, %c0_i32_0 : i32, i32, i32
  }
}

module attributes {stable_mosaic.version = 11 : i64} {
  func.func @_decoder_kernel(%arg0: i32, %arg1: memref<1x8x32xf32, #tpu.memory_space<vmem>>, %arg2: memref<1x8x32xf32, #tpu.memory_space<vmem>>, %arg3: memref<1x1x8xf32, #tpu.memory_space<vmem>>, %arg4: memref<1x8x1xi32, #tpu.memory_space<vmem>>, %arg5: memref<1x32xf32, #tpu.memory_space<vmem>>, %arg6: memref<1x32xf32, #tpu.memory_space<vmem>>, %arg7: memref<1x32x96xf32, #tpu.memory_space<vmem>>, %arg8: memref<1x1x96xf32, #tpu.memory_space<vmem>>, %arg9: memref<1x32x32xf32, #tpu.memory_space<vmem>>, %arg10: memref<1x1x32xf32, #tpu.memory_space<vmem>>, %arg11: memref<1x1x32xf32, #tpu.memory_space<vmem>>, %arg12: memref<1x1x32xf32, #tpu.memory_space<vmem>>, %arg13: memref<1x32x32xf32, #tpu.memory_space<vmem>>, %arg14: memref<1x1x32xf32, #tpu.memory_space<vmem>>, %arg15: memref<1x32x64xf32, #tpu.memory_space<vmem>>, %arg16: memref<1x1x64xf32, #tpu.memory_space<vmem>>, %arg17: memref<1x32x32xf32, #tpu.memory_space<vmem>>, %arg18: memref<1x1x32xf32, #tpu.memory_space<vmem>>, %arg19: memref<1x1x32xf32, #tpu.memory_space<vmem>>, %arg20: memref<1x1x32xf32, #tpu.memory_space<vmem>>, %arg21: memref<1x32x64xf32, #tpu.memory_space<vmem>>, %arg22: memref<1x1x64xf32, #tpu.memory_space<vmem>>, %arg23: memref<1x64x32xf32, #tpu.memory_space<vmem>>, %arg24: memref<1x1x32xf32, #tpu.memory_space<vmem>>, %arg25: memref<1x1x32xf32, #tpu.memory_space<vmem>>, %arg26: memref<1x1x32xf32, #tpu.memory_space<vmem>>, %arg27: memref<32x64xf32, #tpu.memory_space<vmem>>, %arg28: memref<1x64xf32, #tpu.memory_space<vmem>>, %arg29: memref<1x8x64xf32, #tpu.memory_space<vmem>>, %arg30: memref<1x8x1xf32, #tpu.memory_space<vmem>>) attributes {dimension_semantics = [#tpu.dimension_semantics<parallel>], iteration_bounds = array<i64: 2>, scalar_prefetch = 0 : i64, scratch_operands = 0 : i64, tpu.core_type = #tpu.core_type<tc>, window_params = [{transform_indices = @transform_0, window_bounds = array<i64: 1, 8, 32>}, {transform_indices = @transform_1, window_bounds = array<i64: 1, 8, 32>}, {transform_indices = @transform_2, window_bounds = array<i64: 1, 1, 8>}, {transform_indices = @transform_3, window_bounds = array<i64: 1, 8, 1>}, {pipeline_mode = #tpu.pipeline_mode<synchronous>, transform_indices = @transform_4, window_bounds = array<i64: 1, 32>}, {pipeline_mode = #tpu.pipeline_mode<synchronous>, transform_indices = @transform_5, window_bounds = array<i64: 1, 32>}, {pipeline_mode = #tpu.pipeline_mode<synchronous>, transform_indices = @transform_6, window_bounds = array<i64: 1, 32, 96>}, {pipeline_mode = #tpu.pipeline_mode<synchronous>, transform_indices = @transform_7, window_bounds = array<i64: 1, 1, 96>}, {pipeline_mode = #tpu.pipeline_mode<synchronous>, transform_indices = @transform_8, window_bounds = array<i64: 1, 32, 32>}, {pipeline_mode = #tpu.pipeline_mode<synchronous>, transform_indices = @transform_9, window_bounds = array<i64: 1, 1, 32>}, {pipeline_mode = #tpu.pipeline_mode<synchronous>, transform_indices = @transform_10, window_bounds = array<i64: 1, 1, 32>}, {pipeline_mode = #tpu.pipeline_mode<synchronous>, transform_indices = @transform_11, window_bounds = array<i64: 1, 1, 32>}, {pipeline_mode = #tpu.pipeline_mode<synchronous>, transform_indices = @transform_12, window_bounds = array<i64: 1, 32, 32>}, {pipeline_mode = #tpu.pipeline_mode<synchronous>, transform_indices = @transform_13, window_bounds = array<i64: 1, 1, 32>}, {pipeline_mode = #tpu.pipeline_mode<synchronous>, transform_indices = @transform_14, window_bounds = array<i64: 1, 32, 64>}, {pipeline_mode = #tpu.pipeline_mode<synchronous>, transform_indices = @transform_15, window_bounds = array<i64: 1, 1, 64>}, {pipeline_mode = #tpu.pipeline_mode<synchronous>, transform_indices = @transform_16, window_bounds = array<i64: 1, 32, 32>}, {pipeline_mode = #tpu.pipeline_mode<synchronous>, transform_indices = @transform_17, window_bounds = array<i64: 1, 1, 32>}, {pipeline_mode = #tpu.pipeline_mode<synchronous>, transform_indices = @transform_18, window_bounds = array<i64: 1, 1, 32>}, {pipeline_mode = #tpu.pipeline_mode<synchronous>, transform_indices = @transform_19, window_bounds = array<i64: 1, 1, 32>}, {pipeline_mode = #tpu.pipeline_mode<synchronous>, transform_indices = @transform_20, window_bounds = array<i64: 1, 32, 64>}, {pipeline_mode = #tpu.pipeline_mode<synchronous>, transform_indices = @transform_21, window_bounds = array<i64: 1, 1, 64>}, {pipeline_mode = #tpu.pipeline_mode<synchronous>, transform_indices = @transform_22, window_bounds = array<i64: 1, 64, 32>}, {pipeline_mode = #tpu.pipeline_mode<synchronous>, transform_indices = @transform_23, window_bounds = array<i64: 1, 1, 32>}, {pipeline_mode = #tpu.pipeline_mode<synchronous>, transform_indices = @transform_24, window_bounds = array<i64: 1, 1, 32>}, {pipeline_mode = #tpu.pipeline_mode<synchronous>, transform_indices = @transform_25, window_bounds = array<i64: 1, 1, 32>}, {pipeline_mode = #tpu.pipeline_mode<synchronous>, transform_indices = @transform_26, window_bounds = array<i64: 32, 64>}, {pipeline_mode = #tpu.pipeline_mode<synchronous>, transform_indices = @transform_27, window_bounds = array<i64: 1, 64>}, {transform_indices = @transform_28, window_bounds = array<i64: 1, 8, 64>}, {transform_indices = @transform_29, window_bounds = array<i64: 1, 8, 1>}]} {
    %c0 = arith.constant 0 : index
    %c0_0 = arith.constant 0 : index
    %c0_1 = arith.constant 0 : index
    %0 = vector.load %arg1[%c0, %c0_0, %c0_1] : memref<1x8x32xf32, #tpu.memory_space<vmem>>, vector<1x8x32xf32>
    %1 = vector.shape_cast %0 : vector<1x8x32xf32> to vector<8x32xf32>
    %c0_2 = arith.constant 0 : index
    %c0_3 = arith.constant 0 : index
    %c0_4 = arith.constant 0 : index
    %2 = vector.load %arg2[%c0_2, %c0_3, %c0_4] : memref<1x8x32xf32, #tpu.memory_space<vmem>>, vector<1x8x32xf32>
    %3 = vector.shape_cast %2 : vector<1x8x32xf32> to vector<8x32xf32>
    %c0_5 = arith.constant 0 : index
    %c0_6 = arith.constant 0 : index
    %c0_7 = arith.constant 0 : index
    %4 = vector.load %arg3[%c0_5, %c0_6, %c0_7] : memref<1x1x8xf32, #tpu.memory_space<vmem>>, vector<1x1x8xf32>
    %5 = vector.shape_cast %4 : vector<1x1x8xf32> to vector<1x8xf32>
    %c0_8 = arith.constant 0 : index
    %c0_9 = arith.constant 0 : index
    %c0_10 = arith.constant 0 : index
    %6 = vector.load %arg4[%c0_8, %c0_9, %c0_10] : memref<1x8x1xi32, #tpu.memory_space<vmem>>, vector<1x8x1xi32>
    %7 = vector.shape_cast %6 : vector<1x8x1xi32> to vector<8x1xi32>
    %cst = arith.constant 1.000000e+00 : f32
    %8 = vector.broadcast %cst : f32 to vector<1x8xf32>
    %9 = arith.subf %8, %5 : vector<1x8xf32>
    %cst_11 = arith.constant -1.000000e+09 : f32
    %10 = vector.broadcast %cst_11 : f32 to vector<1x8xf32>
    %11 = arith.mulf %9, %10 : vector<1x8xf32>
    %12 = tpu.iota {dimensions = array<i32: 0>} : vector<8x8xi32>
    %13 = tpu.iota {dimensions = array<i32: 1>} : vector<8x8xi32>
    %14 = arith.cmpi sle, %13, %12 : vector<8x8xi32>
    %cst_12 = arith.constant 0.000000e+00 : f32
    %cst_13 = arith.constant -1.000000e+09 : f32
    %15 = vector.broadcast %cst_12 : f32 to vector<8x8xf32>
    %16 = vector.broadcast %cst_13 : f32 to vector<8x8xf32>
    %17 = arith.select %14, %15, %16 : vector<8x8xi1>, vector<8x8xf32>
    %c0_14 = arith.constant 0 : index
    %c0_15 = arith.constant 0 : index
    %18 = vector.load %arg5[%c0_14, %c0_15] : memref<1x32xf32, #tpu.memory_space<vmem>>, vector<1x32xf32>
    %c0_16 = arith.constant 0 : index
    %c0_17 = arith.constant 0 : index
    %19 = vector.load %arg6[%c0_16, %c0_17] : memref<1x32xf32, #tpu.memory_space<vmem>>, vector<1x32xf32>
    %cst_18 = arith.constant dense<0.000000e+00> : vector<8xf32>
    %20 = vector.multi_reduction <add>, %1, %cst_18 [1] : vector<8x32xf32> to vector<8xf32>
    %21 = vector.shape_cast %20 : vector<8xf32> to vector<8x1xf32>
    %cst_19 = arith.constant 3.200000e+01 : f32
    %22 = vector.broadcast %cst_19 : f32 to vector<8x1xf32>
    %23 = arith.divf %21, %22 : vector<8x1xf32>
    %24 = vector.broadcast %23 : vector<8x1xf32> to vector<8x32xf32>
    %25 = arith.subf %1, %24 : vector<8x32xf32>
    %26 = arith.mulf %25, %25 : vector<8x32xf32>
    %cst_20 = arith.constant dense<0.000000e+00> : vector<8xf32>
    %27 = vector.multi_reduction <add>, %26, %cst_20 [1] : vector<8x32xf32> to vector<8xf32>
    %28 = vector.shape_cast %27 : vector<8xf32> to vector<8x1xf32>
    %cst_21 = arith.constant 3.200000e+01 : f32
    %29 = vector.broadcast %cst_21 : f32 to vector<8x1xf32>
    %30 = arith.divf %28, %29 : vector<8x1xf32>
    %31 = vector.broadcast %23 : vector<8x1xf32> to vector<8x32xf32>
    %32 = arith.subf %1, %31 : vector<8x32xf32>
    %cst_22 = arith.constant 9.99999974E-6 : f32
    %33 = vector.broadcast %cst_22 : f32 to vector<8x1xf32>
    %34 = arith.addf %30, %33 : vector<8x1xf32>
    %35 = math.rsqrt %34 : vector<8x1xf32>
    %36 = vector.broadcast %35 : vector<8x1xf32> to vector<8x32xf32>
    %37 = arith.mulf %32, %36 : vector<8x32xf32>
    %38 = vector.broadcast %18 : vector<1x32xf32> to vector<8x32xf32>
    %39 = arith.mulf %37, %38 : vector<8x32xf32>
    %40 = vector.broadcast %19 : vector<1x32xf32> to vector<8x32xf32>
    %41 = arith.addf %39, %40 : vector<8x32xf32>
    %c0_23 = arith.constant 0 : index
    %c0_24 = arith.constant 0 : index
    %c0_25 = arith.constant 0 : index
    %42 = vector.load %arg7[%c0_23, %c0_24, %c0_25] : memref<1x32x96xf32, #tpu.memory_space<vmem>>, vector<1x32x96xf32>
    %43 = vector.shape_cast %42 : vector<1x32x96xf32> to vector<32x96xf32>
    %cst_26 = arith.constant dense<0.000000e+00> : vector<8x96xf32>
    %44 = tpu.matmul %41, %43, %cst_26 {dimension_numbers = #tpu.dot_dimension_numbers<[1], [0], [0], [1], [0, 0, 1, 1], [], []>} : vector<8x32xf32>, vector<32x96xf32>, vector<8x96xf32> -> vector<8x96xf32>
    %c0_27 = arith.constant 0 : index
    %c0_28 = arith.constant 0 : index
    %c0_29 = arith.constant 0 : index
    %45 = vector.load %arg8[%c0_27, %c0_28, %c0_29] : memref<1x1x96xf32, #tpu.memory_space<vmem>>, vector<1x1x96xf32>
    %46 = vector.shape_cast %45 : vector<1x1x96xf32> to vector<1x96xf32>
    %47 = vector.broadcast %46 : vector<1x96xf32> to vector<8x96xf32>
    %48 = arith.addf %44, %47 : vector<8x96xf32>
    %49 = vector.extract_strided_slice %48 {offsets = [0, 0], sizes = [8, 32], strides = [1, 1]} : vector<8x96xf32> to vector<8x32xf32>
    %50 = vector.extract_strided_slice %48 {offsets = [0, 32], sizes = [8, 32], strides = [1, 1]} : vector<8x96xf32> to vector<8x32xf32>
    %51 = vector.extract_strided_slice %48 {offsets = [0, 64], sizes = [8, 32], strides = [1, 1]} : vector<8x96xf32> to vector<8x32xf32>
    %c0_30 = arith.constant 0 : index
    %c0_31 = arith.constant 0 : index
    %c0_32 = arith.constant 0 : index
    %52 = vector.load %arg9[%c0_30, %c0_31, %c0_32] : memref<1x32x32xf32, #tpu.memory_space<vmem>>, vector<1x32x32xf32>
    %53 = vector.shape_cast %52 : vector<1x32x32xf32> to vector<32x32xf32>
    %c0_33 = arith.constant 0 : index
    %c0_34 = arith.constant 0 : index
    %c0_35 = arith.constant 0 : index
    %54 = vector.load %arg10[%c0_33, %c0_34, %c0_35] : memref<1x1x32xf32, #tpu.memory_space<vmem>>, vector<1x1x32xf32>
    %55 = vector.shape_cast %54 : vector<1x1x32xf32> to vector<1x32xf32>
    %cst_36 = arith.constant 0.000000e+00 : f32
    %56 = vector.broadcast %cst_36 : f32 to vector<8x32xf32>
    %57 = vector.extract_strided_slice %49 {offsets = [0, 0], sizes = [8, 16], strides = [1, 1]} : vector<8x32xf32> to vector<8x16xf32>
    %cst_37 = arith.constant 2.500000e-01 : f32
    %58 = vector.broadcast %cst_37 : f32 to vector<8x16xf32>
    %59 = arith.mulf %57, %58 : vector<8x16xf32>
    %60 = vector.extract_strided_slice %50 {offsets = [0, 0], sizes = [8, 16], strides = [1, 1]} : vector<8x32xf32> to vector<8x16xf32>
    %61 = tpu.transpose %60, [1, 0] : vector<8x16xf32> -> vector<16x8xf32>
    %cst_38 = arith.constant dense<0.000000e+00> : vector<8x8xf32>
    %62 = tpu.matmul %59, %61, %cst_38 {dimension_numbers = #tpu.dot_dimension_numbers<[1], [0], [0], [1], [0, 0, 1, 1], [], []>} : vector<8x16xf32>, vector<16x8xf32>, vector<8x8xf32> -> vector<8x8xf32>
    %63 = arith.addf %62, %17 : vector<8x8xf32>
    %cst_39 = arith.constant dense<0xFF800000> : vector<8xf32>
    %64 = vector.multi_reduction <maximumf>, %63, %cst_39 [1] : vector<8x8xf32> to vector<8xf32>
    %65 = vector.shape_cast %64 : vector<8xf32> to vector<8x1xf32>
    %66 = vector.broadcast %65 : vector<8x1xf32> to vector<8x8xf32>
    %67 = arith.subf %63, %66 : vector<8x8xf32>
    %68 = math.exp %67 : vector<8x8xf32>
    %cst_40 = arith.constant dense<0.000000e+00> : vector<8xf32>
    %69 = vector.multi_reduction <add>, %68, %cst_40 [1] : vector<8x8xf32> to vector<8xf32>
    %70 = vector.shape_cast %69 : vector<8xf32> to vector<8x1xf32>
    %71 = vector.extract_strided_slice %51 {offsets = [0, 0], sizes = [8, 16], strides = [1, 1]} : vector<8x32xf32> to vector<8x16xf32>
    %cst_41 = arith.constant dense<0.000000e+00> : vector<8x16xf32>
    %72 = tpu.matmul %68, %71, %cst_41 {dimension_numbers = #tpu.dot_dimension_numbers<[1], [0], [0], [1], [0, 0, 1, 1], [], []>} : vector<8x8xf32>, vector<8x16xf32>, vector<8x16xf32> -> vector<8x16xf32>
    %73 = tpu.reciprocal %70 {approx = true} : vector<8x1xf32> -> vector<8x1xf32>
    %74 = vector.broadcast %73 : vector<8x1xf32> to vector<8x16xf32>
    %75 = arith.mulf %72, %74 : vector<8x16xf32>
    %76 = vector.extract_strided_slice %53 {offsets = [0, 0], sizes = [16, 32], strides = [1, 1]} : vector<32x32xf32> to vector<16x32xf32>
    %cst_42 = arith.constant dense<0.000000e+00> : vector<8x32xf32>
    %77 = tpu.matmul %75, %76, %cst_42 {dimension_numbers = #tpu.dot_dimension_numbers<[1], [0], [0], [1], [0, 0, 1, 1], [], []>} : vector<8x16xf32>, vector<16x32xf32>, vector<8x32xf32> -> vector<8x32xf32>
    %78 = arith.addf %56, %77 : vector<8x32xf32>
    %79 = vector.extract_strided_slice %49 {offsets = [0, 16], sizes = [8, 16], strides = [1, 1]} : vector<8x32xf32> to vector<8x16xf32>
    %cst_43 = arith.constant 2.500000e-01 : f32
    %80 = vector.broadcast %cst_43 : f32 to vector<8x16xf32>
    %81 = arith.mulf %79, %80 : vector<8x16xf32>
    %82 = vector.extract_strided_slice %50 {offsets = [0, 16], sizes = [8, 16], strides = [1, 1]} : vector<8x32xf32> to vector<8x16xf32>
    %83 = tpu.transpose %82, [1, 0] : vector<8x16xf32> -> vector<16x8xf32>
    %cst_44 = arith.constant dense<0.000000e+00> : vector<8x8xf32>
    %84 = tpu.matmul %81, %83, %cst_44 {dimension_numbers = #tpu.dot_dimension_numbers<[1], [0], [0], [1], [0, 0, 1, 1], [], []>} : vector<8x16xf32>, vector<16x8xf32>, vector<8x8xf32> -> vector<8x8xf32>
    %85 = arith.addf %84, %17 : vector<8x8xf32>
    %cst_45 = arith.constant dense<0xFF800000> : vector<8xf32>
    %86 = vector.multi_reduction <maximumf>, %85, %cst_45 [1] : vector<8x8xf32> to vector<8xf32>
    %87 = vector.shape_cast %86 : vector<8xf32> to vector<8x1xf32>
    %88 = vector.broadcast %87 : vector<8x1xf32> to vector<8x8xf32>
    %89 = arith.subf %85, %88 : vector<8x8xf32>
    %90 = math.exp %89 : vector<8x8xf32>
    %cst_46 = arith.constant dense<0.000000e+00> : vector<8xf32>
    %91 = vector.multi_reduction <add>, %90, %cst_46 [1] : vector<8x8xf32> to vector<8xf32>
    %92 = vector.shape_cast %91 : vector<8xf32> to vector<8x1xf32>
    %93 = vector.extract_strided_slice %51 {offsets = [0, 16], sizes = [8, 16], strides = [1, 1]} : vector<8x32xf32> to vector<8x16xf32>
    %cst_47 = arith.constant dense<0.000000e+00> : vector<8x16xf32>
    %94 = tpu.matmul %90, %93, %cst_47 {dimension_numbers = #tpu.dot_dimension_numbers<[1], [0], [0], [1], [0, 0, 1, 1], [], []>} : vector<8x8xf32>, vector<8x16xf32>, vector<8x16xf32> -> vector<8x16xf32>
    %95 = tpu.reciprocal %92 {approx = true} : vector<8x1xf32> -> vector<8x1xf32>
    %96 = vector.broadcast %95 : vector<8x1xf32> to vector<8x16xf32>
    %97 = arith.mulf %94, %96 : vector<8x16xf32>
    %98 = vector.extract_strided_slice %53 {offsets = [16, 0], sizes = [16, 32], strides = [1, 1]} : vector<32x32xf32> to vector<16x32xf32>
    %cst_48 = arith.constant dense<0.000000e+00> : vector<8x32xf32>
    %99 = tpu.matmul %97, %98, %cst_48 {dimension_numbers = #tpu.dot_dimension_numbers<[1], [0], [0], [1], [0, 0, 1, 1], [], []>} : vector<8x16xf32>, vector<16x32xf32>, vector<8x32xf32> -> vector<8x32xf32>
    %100 = arith.addf %78, %99 : vector<8x32xf32>
    %101 = vector.broadcast %55 : vector<1x32xf32> to vector<8x32xf32>
    %102 = arith.addf %100, %101 : vector<8x32xf32>
    %103 = arith.addf %41, %102 : vector<8x32xf32>
    %c0_49 = arith.constant 0 : index
    %c0_50 = arith.constant 0 : index
    %c0_51 = arith.constant 0 : index
    %104 = vector.load %arg11[%c0_49, %c0_50, %c0_51] : memref<1x1x32xf32, #tpu.memory_space<vmem>>, vector<1x1x32xf32>
    %105 = vector.shape_cast %104 : vector<1x1x32xf32> to vector<1x32xf32>
    %c0_52 = arith.constant 0 : index
    %c0_53 = arith.constant 0 : index
    %c0_54 = arith.constant 0 : index
    %106 = vector.load %arg12[%c0_52, %c0_53, %c0_54] : memref<1x1x32xf32, #tpu.memory_space<vmem>>, vector<1x1x32xf32>
    %107 = vector.shape_cast %106 : vector<1x1x32xf32> to vector<1x32xf32>
    %cst_55 = arith.constant dense<0.000000e+00> : vector<8xf32>
    %108 = vector.multi_reduction <add>, %103, %cst_55 [1] : vector<8x32xf32> to vector<8xf32>
    %109 = vector.shape_cast %108 : vector<8xf32> to vector<8x1xf32>
    %cst_56 = arith.constant 3.200000e+01 : f32
    %110 = vector.broadcast %cst_56 : f32 to vector<8x1xf32>
    %111 = arith.divf %109, %110 : vector<8x1xf32>
    %112 = vector.broadcast %111 : vector<8x1xf32> to vector<8x32xf32>
    %113 = arith.subf %103, %112 : vector<8x32xf32>
    %114 = arith.mulf %113, %113 : vector<8x32xf32>
    %cst_57 = arith.constant dense<0.000000e+00> : vector<8xf32>
    %115 = vector.multi_reduction <add>, %114, %cst_57 [1] : vector<8x32xf32> to vector<8xf32>
    %116 = vector.shape_cast %115 : vector<8xf32> to vector<8x1xf32>
    %cst_58 = arith.constant 3.200000e+01 : f32
    %117 = vector.broadcast %cst_58 : f32 to vector<8x1xf32>
    %118 = arith.divf %116, %117 : vector<8x1xf32>
    %119 = vector.broadcast %111 : vector<8x1xf32> to vector<8x32xf32>
    %120 = arith.subf %103, %119 : vector<8x32xf32>
    %cst_59 = arith.constant 9.99999974E-6 : f32
    %121 = vector.broadcast %cst_59 : f32 to vector<8x1xf32>
    %122 = arith.addf %118, %121 : vector<8x1xf32>
    %123 = math.rsqrt %122 : vector<8x1xf32>
    %124 = vector.broadcast %123 : vector<8x1xf32> to vector<8x32xf32>
    %125 = arith.mulf %120, %124 : vector<8x32xf32>
    %126 = vector.broadcast %105 : vector<1x32xf32> to vector<8x32xf32>
    %127 = arith.mulf %125, %126 : vector<8x32xf32>
    %128 = vector.broadcast %107 : vector<1x32xf32> to vector<8x32xf32>
    %129 = arith.addf %127, %128 : vector<8x32xf32>
    %c0_60 = arith.constant 0 : index
    %c0_61 = arith.constant 0 : index
    %c0_62 = arith.constant 0 : index
    %130 = vector.load %arg13[%c0_60, %c0_61, %c0_62] : memref<1x32x32xf32, #tpu.memory_space<vmem>>, vector<1x32x32xf32>
    %131 = vector.shape_cast %130 : vector<1x32x32xf32> to vector<32x32xf32>
    %cst_63 = arith.constant dense<0.000000e+00> : vector<8x32xf32>
    %132 = tpu.matmul %129, %131, %cst_63 {dimension_numbers = #tpu.dot_dimension_numbers<[1], [0], [0], [1], [0, 0, 1, 1], [], []>} : vector<8x32xf32>, vector<32x32xf32>, vector<8x32xf32> -> vector<8x32xf32>
    %c0_64 = arith.constant 0 : index
    %c0_65 = arith.constant 0 : index
    %c0_66 = arith.constant 0 : index
    %133 = vector.load %arg14[%c0_64, %c0_65, %c0_66] : memref<1x1x32xf32, #tpu.memory_space<vmem>>, vector<1x1x32xf32>
    %134 = vector.shape_cast %133 : vector<1x1x32xf32> to vector<1x32xf32>
    %135 = vector.broadcast %134 : vector<1x32xf32> to vector<8x32xf32>
    %136 = arith.addf %132, %135 : vector<8x32xf32>
    %c0_67 = arith.constant 0 : index
    %c0_68 = arith.constant 0 : index
    %c0_69 = arith.constant 0 : index
    %137 = vector.load %arg15[%c0_67, %c0_68, %c0_69] : memref<1x32x64xf32, #tpu.memory_space<vmem>>, vector<1x32x64xf32>
    %138 = vector.shape_cast %137 : vector<1x32x64xf32> to vector<32x64xf32>
    %cst_70 = arith.constant dense<0.000000e+00> : vector<8x64xf32>
    %139 = tpu.matmul %3, %138, %cst_70 {dimension_numbers = #tpu.dot_dimension_numbers<[1], [0], [0], [1], [0, 0, 1, 1], [], []>} : vector<8x32xf32>, vector<32x64xf32>, vector<8x64xf32> -> vector<8x64xf32>
    %c0_71 = arith.constant 0 : index
    %c0_72 = arith.constant 0 : index
    %c0_73 = arith.constant 0 : index
    %140 = vector.load %arg16[%c0_71, %c0_72, %c0_73] : memref<1x1x64xf32, #tpu.memory_space<vmem>>, vector<1x1x64xf32>
    %141 = vector.shape_cast %140 : vector<1x1x64xf32> to vector<1x64xf32>
    %142 = vector.broadcast %141 : vector<1x64xf32> to vector<8x64xf32>
    %143 = arith.addf %139, %142 : vector<8x64xf32>
    %144 = vector.extract_strided_slice %143 {offsets = [0, 0], sizes = [8, 32], strides = [1, 1]} : vector<8x64xf32> to vector<8x32xf32>
    %145 = vector.extract_strided_slice %143 {offsets = [0, 32], sizes = [8, 32], strides = [1, 1]} : vector<8x64xf32> to vector<8x32xf32>
    %c0_74 = arith.constant 0 : index
    %c0_75 = arith.constant 0 : index
    %c0_76 = arith.constant 0 : index
    %146 = vector.load %arg17[%c0_74, %c0_75, %c0_76] : memref<1x32x32xf32, #tpu.memory_space<vmem>>, vector<1x32x32xf32>
    %147 = vector.shape_cast %146 : vector<1x32x32xf32> to vector<32x32xf32>
    %c0_77 = arith.constant 0 : index
    %c0_78 = arith.constant 0 : index
    %c0_79 = arith.constant 0 : index
    %148 = vector.load %arg18[%c0_77, %c0_78, %c0_79] : memref<1x1x32xf32, #tpu.memory_space<vmem>>, vector<1x1x32xf32>
    %149 = vector.shape_cast %148 : vector<1x1x32xf32> to vector<1x32xf32>
    %cst_80 = arith.constant 0.000000e+00 : f32
    %150 = vector.broadcast %cst_80 : f32 to vector<8x32xf32>
    %151 = vector.extract_strided_slice %136 {offsets = [0, 0], sizes = [8, 16], strides = [1, 1]} : vector<8x32xf32> to vector<8x16xf32>
    %cst_81 = arith.constant 2.500000e-01 : f32
    %152 = vector.broadcast %cst_81 : f32 to vector<8x16xf32>
    %153 = arith.mulf %151, %152 : vector<8x16xf32>
    %154 = vector.extract_strided_slice %144 {offsets = [0, 0], sizes = [8, 16], strides = [1, 1]} : vector<8x32xf32> to vector<8x16xf32>
    %155 = tpu.transpose %154, [1, 0] : vector<8x16xf32> -> vector<16x8xf32>
    %cst_82 = arith.constant dense<0.000000e+00> : vector<8x8xf32>
    %156 = tpu.matmul %153, %155, %cst_82 {dimension_numbers = #tpu.dot_dimension_numbers<[1], [0], [0], [1], [0, 0, 1, 1], [], []>} : vector<8x16xf32>, vector<16x8xf32>, vector<8x8xf32> -> vector<8x8xf32>
    %157 = vector.broadcast %11 : vector<1x8xf32> to vector<8x8xf32>
    %158 = arith.addf %156, %157 : vector<8x8xf32>
    %cst_83 = arith.constant dense<0xFF800000> : vector<8xf32>
    %159 = vector.multi_reduction <maximumf>, %158, %cst_83 [1] : vector<8x8xf32> to vector<8xf32>
    %160 = vector.shape_cast %159 : vector<8xf32> to vector<8x1xf32>
    %161 = vector.broadcast %160 : vector<8x1xf32> to vector<8x8xf32>
    %162 = arith.subf %158, %161 : vector<8x8xf32>
    %163 = math.exp %162 : vector<8x8xf32>
    %cst_84 = arith.constant dense<0.000000e+00> : vector<8xf32>
    %164 = vector.multi_reduction <add>, %163, %cst_84 [1] : vector<8x8xf32> to vector<8xf32>
    %165 = vector.shape_cast %164 : vector<8xf32> to vector<8x1xf32>
    %166 = vector.extract_strided_slice %145 {offsets = [0, 0], sizes = [8, 16], strides = [1, 1]} : vector<8x32xf32> to vector<8x16xf32>
    %cst_85 = arith.constant dense<0.000000e+00> : vector<8x16xf32>
    %167 = tpu.matmul %163, %166, %cst_85 {dimension_numbers = #tpu.dot_dimension_numbers<[1], [0], [0], [1], [0, 0, 1, 1], [], []>} : vector<8x8xf32>, vector<8x16xf32>, vector<8x16xf32> -> vector<8x16xf32>
    %168 = tpu.reciprocal %165 {approx = true} : vector<8x1xf32> -> vector<8x1xf32>
    %169 = vector.broadcast %168 : vector<8x1xf32> to vector<8x16xf32>
    %170 = arith.mulf %167, %169 : vector<8x16xf32>
    %171 = vector.extract_strided_slice %147 {offsets = [0, 0], sizes = [16, 32], strides = [1, 1]} : vector<32x32xf32> to vector<16x32xf32>
    %cst_86 = arith.constant dense<0.000000e+00> : vector<8x32xf32>
    %172 = tpu.matmul %170, %171, %cst_86 {dimension_numbers = #tpu.dot_dimension_numbers<[1], [0], [0], [1], [0, 0, 1, 1], [], []>} : vector<8x16xf32>, vector<16x32xf32>, vector<8x32xf32> -> vector<8x32xf32>
    %173 = arith.addf %150, %172 : vector<8x32xf32>
    %174 = vector.extract_strided_slice %136 {offsets = [0, 16], sizes = [8, 16], strides = [1, 1]} : vector<8x32xf32> to vector<8x16xf32>
    %cst_87 = arith.constant 2.500000e-01 : f32
    %175 = vector.broadcast %cst_87 : f32 to vector<8x16xf32>
    %176 = arith.mulf %174, %175 : vector<8x16xf32>
    %177 = vector.extract_strided_slice %144 {offsets = [0, 16], sizes = [8, 16], strides = [1, 1]} : vector<8x32xf32> to vector<8x16xf32>
    %178 = tpu.transpose %177, [1, 0] : vector<8x16xf32> -> vector<16x8xf32>
    %cst_88 = arith.constant dense<0.000000e+00> : vector<8x8xf32>
    %179 = tpu.matmul %176, %178, %cst_88 {dimension_numbers = #tpu.dot_dimension_numbers<[1], [0], [0], [1], [0, 0, 1, 1], [], []>} : vector<8x16xf32>, vector<16x8xf32>, vector<8x8xf32> -> vector<8x8xf32>
    %180 = vector.broadcast %11 : vector<1x8xf32> to vector<8x8xf32>
    %181 = arith.addf %179, %180 : vector<8x8xf32>
    %cst_89 = arith.constant dense<0xFF800000> : vector<8xf32>
    %182 = vector.multi_reduction <maximumf>, %181, %cst_89 [1] : vector<8x8xf32> to vector<8xf32>
    %183 = vector.shape_cast %182 : vector<8xf32> to vector<8x1xf32>
    %184 = vector.broadcast %183 : vector<8x1xf32> to vector<8x8xf32>
    %185 = arith.subf %181, %184 : vector<8x8xf32>
    %186 = math.exp %185 : vector<8x8xf32>
    %cst_90 = arith.constant dense<0.000000e+00> : vector<8xf32>
    %187 = vector.multi_reduction <add>, %186, %cst_90 [1] : vector<8x8xf32> to vector<8xf32>
    %188 = vector.shape_cast %187 : vector<8xf32> to vector<8x1xf32>
    %189 = vector.extract_strided_slice %145 {offsets = [0, 16], sizes = [8, 16], strides = [1, 1]} : vector<8x32xf32> to vector<8x16xf32>
    %cst_91 = arith.constant dense<0.000000e+00> : vector<8x16xf32>
    %190 = tpu.matmul %186, %189, %cst_91 {dimension_numbers = #tpu.dot_dimension_numbers<[1], [0], [0], [1], [0, 0, 1, 1], [], []>} : vector<8x8xf32>, vector<8x16xf32>, vector<8x16xf32> -> vector<8x16xf32>
    %191 = tpu.reciprocal %188 {approx = true} : vector<8x1xf32> -> vector<8x1xf32>
    %192 = vector.broadcast %191 : vector<8x1xf32> to vector<8x16xf32>
    %193 = arith.mulf %190, %192 : vector<8x16xf32>
    %194 = vector.extract_strided_slice %147 {offsets = [16, 0], sizes = [16, 32], strides = [1, 1]} : vector<32x32xf32> to vector<16x32xf32>
    %cst_92 = arith.constant dense<0.000000e+00> : vector<8x32xf32>
    %195 = tpu.matmul %193, %194, %cst_92 {dimension_numbers = #tpu.dot_dimension_numbers<[1], [0], [0], [1], [0, 0, 1, 1], [], []>} : vector<8x16xf32>, vector<16x32xf32>, vector<8x32xf32> -> vector<8x32xf32>
    %196 = arith.addf %173, %195 : vector<8x32xf32>
    %197 = vector.broadcast %149 : vector<1x32xf32> to vector<8x32xf32>
    %198 = arith.addf %196, %197 : vector<8x32xf32>
    %199 = arith.addf %129, %198 : vector<8x32xf32>
    %c0_93 = arith.constant 0 : index
    %c0_94 = arith.constant 0 : index
    %c0_95 = arith.constant 0 : index
    %200 = vector.load %arg19[%c0_93, %c0_94, %c0_95] : memref<1x1x32xf32, #tpu.memory_space<vmem>>, vector<1x1x32xf32>
    %201 = vector.shape_cast %200 : vector<1x1x32xf32> to vector<1x32xf32>
    %c0_96 = arith.constant 0 : index
    %c0_97 = arith.constant 0 : index
    %c0_98 = arith.constant 0 : index
    %202 = vector.load %arg20[%c0_96, %c0_97, %c0_98] : memref<1x1x32xf32, #tpu.memory_space<vmem>>, vector<1x1x32xf32>
    %203 = vector.shape_cast %202 : vector<1x1x32xf32> to vector<1x32xf32>
    %cst_99 = arith.constant dense<0.000000e+00> : vector<8xf32>
    %204 = vector.multi_reduction <add>, %199, %cst_99 [1] : vector<8x32xf32> to vector<8xf32>
    %205 = vector.shape_cast %204 : vector<8xf32> to vector<8x1xf32>
    %cst_100 = arith.constant 3.200000e+01 : f32
    %206 = vector.broadcast %cst_100 : f32 to vector<8x1xf32>
    %207 = arith.divf %205, %206 : vector<8x1xf32>
    %208 = vector.broadcast %207 : vector<8x1xf32> to vector<8x32xf32>
    %209 = arith.subf %199, %208 : vector<8x32xf32>
    %210 = arith.mulf %209, %209 : vector<8x32xf32>
    %cst_101 = arith.constant dense<0.000000e+00> : vector<8xf32>
    %211 = vector.multi_reduction <add>, %210, %cst_101 [1] : vector<8x32xf32> to vector<8xf32>
    %212 = vector.shape_cast %211 : vector<8xf32> to vector<8x1xf32>
    %cst_102 = arith.constant 3.200000e+01 : f32
    %213 = vector.broadcast %cst_102 : f32 to vector<8x1xf32>
    %214 = arith.divf %212, %213 : vector<8x1xf32>
    %215 = vector.broadcast %207 : vector<8x1xf32> to vector<8x32xf32>
    %216 = arith.subf %199, %215 : vector<8x32xf32>
    %cst_103 = arith.constant 9.99999974E-6 : f32
    %217 = vector.broadcast %cst_103 : f32 to vector<8x1xf32>
    %218 = arith.addf %214, %217 : vector<8x1xf32>
    %219 = math.rsqrt %218 : vector<8x1xf32>
    %220 = vector.broadcast %219 : vector<8x1xf32> to vector<8x32xf32>
    %221 = arith.mulf %216, %220 : vector<8x32xf32>
    %222 = vector.broadcast %201 : vector<1x32xf32> to vector<8x32xf32>
    %223 = arith.mulf %221, %222 : vector<8x32xf32>
    %224 = vector.broadcast %203 : vector<1x32xf32> to vector<8x32xf32>
    %225 = arith.addf %223, %224 : vector<8x32xf32>
    %c0_104 = arith.constant 0 : index
    %c0_105 = arith.constant 0 : index
    %c0_106 = arith.constant 0 : index
    %226 = vector.load %arg21[%c0_104, %c0_105, %c0_106] : memref<1x32x64xf32, #tpu.memory_space<vmem>>, vector<1x32x64xf32>
    %227 = vector.shape_cast %226 : vector<1x32x64xf32> to vector<32x64xf32>
    %c0_107 = arith.constant 0 : index
    %c0_108 = arith.constant 0 : index
    %c0_109 = arith.constant 0 : index
    %228 = vector.load %arg22[%c0_107, %c0_108, %c0_109] : memref<1x1x64xf32, #tpu.memory_space<vmem>>, vector<1x1x64xf32>
    %229 = vector.shape_cast %228 : vector<1x1x64xf32> to vector<1x64xf32>
    %c0_110 = arith.constant 0 : index
    %c0_111 = arith.constant 0 : index
    %c0_112 = arith.constant 0 : index
    %230 = vector.load %arg23[%c0_110, %c0_111, %c0_112] : memref<1x64x32xf32, #tpu.memory_space<vmem>>, vector<1x64x32xf32>
    %231 = vector.shape_cast %230 : vector<1x64x32xf32> to vector<64x32xf32>
    %c0_113 = arith.constant 0 : index
    %c0_114 = arith.constant 0 : index
    %c0_115 = arith.constant 0 : index
    %232 = vector.load %arg24[%c0_113, %c0_114, %c0_115] : memref<1x1x32xf32, #tpu.memory_space<vmem>>, vector<1x1x32xf32>
    %233 = vector.shape_cast %232 : vector<1x1x32xf32> to vector<1x32xf32>
    %cst_116 = arith.constant dense<0.000000e+00> : vector<8x64xf32>
    %234 = tpu.matmul %225, %227, %cst_116 {dimension_numbers = #tpu.dot_dimension_numbers<[1], [0], [0], [1], [0, 0, 1, 1], [], []>} : vector<8x32xf32>, vector<32x64xf32>, vector<8x64xf32> -> vector<8x64xf32>
    %235 = vector.broadcast %229 : vector<1x64xf32> to vector<8x64xf32>
    %236 = arith.addf %234, %235 : vector<8x64xf32>
    %237 = arith.mulf %236, %236 : vector<8x64xf32>
    %238 = arith.mulf %236, %237 : vector<8x64xf32>
    %cst_117 = arith.constant 4.471500e-02 : f32
    %239 = vector.broadcast %cst_117 : f32 to vector<8x64xf32>
    %240 = arith.mulf %239, %238 : vector<8x64xf32>
    %241 = arith.addf %236, %240 : vector<8x64xf32>
    %cst_118 = arith.constant 0.797884583 : f32
    %242 = vector.broadcast %cst_118 : f32 to vector<8x64xf32>
    %243 = arith.mulf %242, %241 : vector<8x64xf32>
    %244 = math.tanh %243 : vector<8x64xf32>
    %cst_119 = arith.constant 1.000000e+00 : f32
    %245 = vector.broadcast %cst_119 : f32 to vector<8x64xf32>
    %246 = arith.addf %245, %244 : vector<8x64xf32>
    %cst_120 = arith.constant 5.000000e-01 : f32
    %247 = vector.broadcast %cst_120 : f32 to vector<8x64xf32>
    %248 = arith.mulf %247, %246 : vector<8x64xf32>
    %249 = arith.mulf %236, %248 : vector<8x64xf32>
    %cst_121 = arith.constant dense<0.000000e+00> : vector<8x32xf32>
    %250 = tpu.matmul %249, %231, %cst_121 {dimension_numbers = #tpu.dot_dimension_numbers<[1], [0], [0], [1], [0, 0, 1, 1], [], []>} : vector<8x64xf32>, vector<64x32xf32>, vector<8x32xf32> -> vector<8x32xf32>
    %251 = vector.broadcast %233 : vector<1x32xf32> to vector<8x32xf32>
    %252 = arith.addf %250, %251 : vector<8x32xf32>
    %253 = arith.addf %225, %252 : vector<8x32xf32>
    %c0_122 = arith.constant 0 : index
    %c0_123 = arith.constant 0 : index
    %c0_124 = arith.constant 0 : index
    %254 = vector.load %arg25[%c0_122, %c0_123, %c0_124] : memref<1x1x32xf32, #tpu.memory_space<vmem>>, vector<1x1x32xf32>
    %255 = vector.shape_cast %254 : vector<1x1x32xf32> to vector<1x32xf32>
    %c0_125 = arith.constant 0 : index
    %c0_126 = arith.constant 0 : index
    %c0_127 = arith.constant 0 : index
    %256 = vector.load %arg26[%c0_125, %c0_126, %c0_127] : memref<1x1x32xf32, #tpu.memory_space<vmem>>, vector<1x1x32xf32>
    %257 = vector.shape_cast %256 : vector<1x1x32xf32> to vector<1x32xf32>
    %cst_128 = arith.constant dense<0.000000e+00> : vector<8xf32>
    %258 = vector.multi_reduction <add>, %253, %cst_128 [1] : vector<8x32xf32> to vector<8xf32>
    %259 = vector.shape_cast %258 : vector<8xf32> to vector<8x1xf32>
    %cst_129 = arith.constant 3.200000e+01 : f32
    %260 = vector.broadcast %cst_129 : f32 to vector<8x1xf32>
    %261 = arith.divf %259, %260 : vector<8x1xf32>
    %262 = vector.broadcast %261 : vector<8x1xf32> to vector<8x32xf32>
    %263 = arith.subf %253, %262 : vector<8x32xf32>
    %264 = arith.mulf %263, %263 : vector<8x32xf32>
    %cst_130 = arith.constant dense<0.000000e+00> : vector<8xf32>
    %265 = vector.multi_reduction <add>, %264, %cst_130 [1] : vector<8x32xf32> to vector<8xf32>
    %266 = vector.shape_cast %265 : vector<8xf32> to vector<8x1xf32>
    %cst_131 = arith.constant 3.200000e+01 : f32
    %267 = vector.broadcast %cst_131 : f32 to vector<8x1xf32>
    %268 = arith.divf %266, %267 : vector<8x1xf32>
    %269 = vector.broadcast %261 : vector<8x1xf32> to vector<8x32xf32>
    %270 = arith.subf %253, %269 : vector<8x32xf32>
    %cst_132 = arith.constant 9.99999974E-6 : f32
    %271 = vector.broadcast %cst_132 : f32 to vector<8x1xf32>
    %272 = arith.addf %268, %271 : vector<8x1xf32>
    %273 = math.rsqrt %272 : vector<8x1xf32>
    %274 = vector.broadcast %273 : vector<8x1xf32> to vector<8x32xf32>
    %275 = arith.mulf %270, %274 : vector<8x32xf32>
    %276 = vector.broadcast %255 : vector<1x32xf32> to vector<8x32xf32>
    %277 = arith.mulf %275, %276 : vector<8x32xf32>
    %278 = vector.broadcast %257 : vector<1x32xf32> to vector<8x32xf32>
    %279 = arith.addf %277, %278 : vector<8x32xf32>
    %c0_133 = arith.constant 0 : index
    %c0_134 = arith.constant 0 : index
    %280 = vector.load %arg27[%c0_133, %c0_134] : memref<32x64xf32, #tpu.memory_space<vmem>>, vector<32x64xf32>
    %cst_135 = arith.constant dense<0.000000e+00> : vector<8x64xf32>
    %281 = tpu.matmul %279, %280, %cst_135 {dimension_numbers = #tpu.dot_dimension_numbers<[1], [0], [0], [1], [0, 0, 1, 1], [], []>} : vector<8x32xf32>, vector<32x64xf32>, vector<8x64xf32> -> vector<8x64xf32>
    %c0_136 = arith.constant 0 : index
    %c0_137 = arith.constant 0 : index
    %282 = vector.load %arg28[%c0_136, %c0_137] : memref<1x64xf32, #tpu.memory_space<vmem>>, vector<1x64xf32>
    %283 = vector.broadcast %282 : vector<1x64xf32> to vector<8x64xf32>
    %284 = arith.addf %281, %283 : vector<8x64xf32>
    %cst_138 = arith.constant dense<0xFF800000> : vector<8xf32>
    %285 = vector.multi_reduction <maximumf>, %284, %cst_138 [1] : vector<8x64xf32> to vector<8xf32>
    %286 = vector.shape_cast %285 : vector<8xf32> to vector<8x1xf32>
    %287 = vector.broadcast %286 : vector<8x1xf32> to vector<8x64xf32>
    %288 = arith.subf %284, %287 : vector<8x64xf32>
    %289 = math.exp %288 : vector<8x64xf32>
    %cst_139 = arith.constant dense<0.000000e+00> : vector<8xf32>
    %290 = vector.multi_reduction <add>, %289, %cst_139 [1] : vector<8x64xf32> to vector<8xf32>
    %291 = vector.shape_cast %290 : vector<8xf32> to vector<8x1xf32>
    %292 = math.log %291 : vector<8x1xf32>
    %293 = vector.broadcast %292 : vector<8x1xf32> to vector<8x64xf32>
    %294 = arith.subf %288, %293 : vector<8x64xf32>
    %295 = tpu.iota {dimensions = array<i32: 1>} : vector<8x64xi32>
    %296 = vector.broadcast %7 : vector<8x1xi32> to vector<8x64xi32>
    %297 = arith.cmpi eq, %295, %296 : vector<8x64xi32>
    %298 = arith.extui %297 : vector<8x64xi1> to vector<8x64xi32>
    %299 = arith.sitofp %298 : vector<8x64xi32> to vector<8x64xf32>
    %300 = arith.mulf %294, %299 : vector<8x64xf32>
    %cst_140 = arith.constant dense<0.000000e+00> : vector<8xf32>
    %301 = vector.multi_reduction <add>, %300, %cst_140 [1] : vector<8x64xf32> to vector<8xf32>
    %302 = vector.shape_cast %301 : vector<8xf32> to vector<8x1xf32>
    %cst_141 = arith.constant 0.000000e+00 : f32
    %303 = vector.broadcast %cst_141 : f32 to vector<8x1xf32>
    %304 = arith.subf %303, %302 : vector<8x1xf32>
    %c-100_i32 = arith.constant -100 : i32
    %305 = vector.broadcast %c-100_i32 : i32 to vector<8x1xi32>
    %306 = arith.cmpi ne, %7, %305 : vector<8x1xi32>
    %307 = arith.extui %306 : vector<8x1xi1> to vector<8x1xi32>
    %308 = arith.sitofp %307 : vector<8x1xi32> to vector<8x1xf32>
    %c0_142 = arith.constant 0 : index
    %c0_143 = arith.constant 0 : index
    %c0_144 = arith.constant 0 : index
    %309 = vector.load %arg29[%c0_142, %c0_143, %c0_144] : memref<1x8x64xf32, #tpu.memory_space<vmem>>, vector<1x8x64xf32>
    %310 = vector.shape_cast %309 : vector<1x8x64xf32> to vector<8x64xf32>
    %311 = vector.shape_cast %284 : vector<8x64xf32> to vector<1x8x64xf32>
    tpu.vector_store %arg29[%c0_142, %c0_143, %c0_144], %311 {strides = array<i32>} : memref<1x8x64xf32, #tpu.memory_space<vmem>>, vector<1x8x64xf32>,
    %312 = arith.mulf %304, %308 : vector<8x1xf32>
    %c0_145 = arith.constant 0 : index
    %c0_146 = arith.constant 0 : index
    %c0_147 = arith.constant 0 : index
    %313 = vector.load %arg30[%c0_145, %c0_146, %c0_147] : memref<1x8x1xf32, #tpu.memory_space<vmem>>, vector<1x8x1xf32>
    %314 = vector.shape_cast %313 : vector<1x8x1xf32> to vector<8x1xf32>
    %315 = vector.shape_cast %312 : vector<8x1xf32> to vector<1x8x1xf32>
    tpu.vector_store %arg30[%c0_145, %c0_146, %c0_147], %315 {strides = array<i32>} : memref<1x8x1xf32, #tpu.memory_space<vmem>>, vector<1x8x1xf32>,
    return
  }
  func.func @transform_0(%arg0: i32) -> (i32, i32, i32) {
    %c0_i32 = arith.constant 0 : i32
    %c0_i32_0 = arith.constant 0 : i32
    %c0_i32_1 = arith.constant 0 : i32
    return %arg0, %c0_i32, %c0_i32_0 : i32, i32, i32
  }
  func.func @transform_1(%arg0: i32) -> (i32, i32, i32) {
    %c0_i32 = arith.constant 0 : i32
    %c0_i32_0 = arith.constant 0 : i32
    %c0_i32_1 = arith.constant 0 : i32
    return %arg0, %c0_i32, %c0_i32_0 : i32, i32, i32
  }
  func.func @transform_2(%arg0: i32) -> (i32, i32, i32) {
    %c0_i32 = arith.constant 0 : i32
    %c0_i32_0 = arith.constant 0 : i32
    %c0_i32_1 = arith.constant 0 : i32
    return %arg0, %c0_i32, %c0_i32_0 : i32, i32, i32
  }
  func.func @transform_3(%arg0: i32) -> (i32, i32, i32) {
    %c0_i32 = arith.constant 0 : i32
    %c0_i32_0 = arith.constant 0 : i32
    %c0_i32_1 = arith.constant 0 : i32
    return %arg0, %c0_i32, %c0_i32_0 : i32, i32, i32
  }
  func.func @transform_4(%arg0: i32) -> (i32, i32) {
    %c0_i32 = arith.constant 0 : i32
    %c0_i32_0 = arith.constant 0 : i32
    %c0_i32_1 = arith.constant 0 : i32
    return %c0_i32, %c0_i32_0 : i32, i32
  }
  func.func @transform_5(%arg0: i32) -> (i32, i32) {
    %c0_i32 = arith.constant 0 : i32
    %c0_i32_0 = arith.constant 0 : i32
    %c0_i32_1 = arith.constant 0 : i32
    return %c0_i32, %c0_i32_0 : i32, i32
  }
  func.func @transform_6(%arg0: i32) -> (i32, i32, i32) {
    %c0_i32 = arith.constant 0 : i32
    %c0_i32_0 = arith.constant 0 : i32
    %c0_i32_1 = arith.constant 0 : i32
    %c0_i32_2 = arith.constant 0 : i32
    return %c0_i32, %c0_i32_0, %c0_i32_1 : i32, i32, i32
  }
  func.func @transform_7(%arg0: i32) -> (i32, i32, i32) {
    %c0_i32 = arith.constant 0 : i32
    %c0_i32_0 = arith.constant 0 : i32
    %c0_i32_1 = arith.constant 0 : i32
    %c0_i32_2 = arith.constant 0 : i32
    return %c0_i32, %c0_i32_0, %c0_i32_1 : i32, i32, i32
  }
  func.func @transform_8(%arg0: i32) -> (i32, i32, i32) {
    %c0_i32 = arith.constant 0 : i32
    %c0_i32_0 = arith.constant 0 : i32
    %c0_i32_1 = arith.constant 0 : i32
    %c0_i32_2 = arith.constant 0 : i32
    return %c0_i32, %c0_i32_0, %c0_i32_1 : i32, i32, i32
  }
  func.func @transform_9(%arg0: i32) -> (i32, i32, i32) {
    %c0_i32 = arith.constant 0 : i32
    %c0_i32_0 = arith.constant 0 : i32
    %c0_i32_1 = arith.constant 0 : i32
    %c0_i32_2 = arith.constant 0 : i32
    return %c0_i32, %c0_i32_0, %c0_i32_1 : i32, i32, i32
  }
  func.func @transform_10(%arg0: i32) -> (i32, i32, i32) {
    %c0_i32 = arith.constant 0 : i32
    %c0_i32_0 = arith.constant 0 : i32
    %c0_i32_1 = arith.constant 0 : i32
    %c0_i32_2 = arith.constant 0 : i32
    return %c0_i32, %c0_i32_0, %c0_i32_1 : i32, i32, i32
  }
  func.func @transform_11(%arg0: i32) -> (i32, i32, i32) {
    %c0_i32 = arith.constant 0 : i32
    %c0_i32_0 = arith.constant 0 : i32
    %c0_i32_1 = arith.constant 0 : i32
    %c0_i32_2 = arith.constant 0 : i32
    return %c0_i32, %c0_i32_0, %c0_i32_1 : i32, i32, i32
  }
  func.func @transform_12(%arg0: i32) -> (i32, i32, i32) {
    %c0_i32 = arith.constant 0 : i32
    %c0_i32_0 = arith.constant 0 : i32
    %c0_i32_1 = arith.constant 0 : i32
    %c0_i32_2 = arith.constant 0 : i32
    return %c0_i32, %c0_i32_0, %c0_i32_1 : i32, i32, i32
  }
  func.func @transform_13(%arg0: i32) -> (i32, i32, i32) {
    %c0_i32 = arith.constant 0 : i32
    %c0_i32_0 = arith.constant 0 : i32
    %c0_i32_1 = arith.constant 0 : i32
    %c0_i32_2 = arith.constant 0 : i32
    return %c0_i32, %c0_i32_0, %c0_i32_1 : i32, i32, i32
  }
  func.func @transform_14(%arg0: i32) -> (i32, i32, i32) {
    %c0_i32 = arith.constant 0 : i32
    %c0_i32_0 = arith.constant 0 : i32
    %c0_i32_1 = arith.constant 0 : i32
    %c0_i32_2 = arith.constant 0 : i32
    return %c0_i32, %c0_i32_0, %c0_i32_1 : i32, i32, i32
  }
  func.func @transform_15(%arg0: i32) -> (i32, i32, i32) {
    %c0_i32 = arith.constant 0 : i32
    %c0_i32_0 = arith.constant 0 : i32
    %c0_i32_1 = arith.constant 0 : i32
    %c0_i32_2 = arith.constant 0 : i32
    return %c0_i32, %c0_i32_0, %c0_i32_1 : i32, i32, i32
  }
  func.func @transform_16(%arg0: i32) -> (i32, i32, i32) {
    %c0_i32 = arith.constant 0 : i32
    %c0_i32_0 = arith.constant 0 : i32
    %c0_i32_1 = arith.constant 0 : i32
    %c0_i32_2 = arith.constant 0 : i32
    return %c0_i32, %c0_i32_0, %c0_i32_1 : i32, i32, i32
  }
  func.func @transform_17(%arg0: i32) -> (i32, i32, i32) {
    %c0_i32 = arith.constant 0 : i32
    %c0_i32_0 = arith.constant 0 : i32
    %c0_i32_1 = arith.constant 0 : i32
    %c0_i32_2 = arith.constant 0 : i32
    return %c0_i32, %c0_i32_0, %c0_i32_1 : i32, i32, i32
  }
  func.func @transform_18(%arg0: i32) -> (i32, i32, i32) {
    %c0_i32 = arith.constant 0 : i32
    %c0_i32_0 = arith.constant 0 : i32
    %c0_i32_1 = arith.constant 0 : i32
    %c0_i32_2 = arith.constant 0 : i32
    return %c0_i32, %c0_i32_0, %c0_i32_1 : i32, i32, i32
  }
  func.func @transform_19(%arg0: i32) -> (i32, i32, i32) {
    %c0_i32 = arith.constant 0 : i32
    %c0_i32_0 = arith.constant 0 : i32
    %c0_i32_1 = arith.constant 0 : i32
    %c0_i32_2 = arith.constant 0 : i32
    return %c0_i32, %c0_i32_0, %c0_i32_1 : i32, i32, i32
  }
  func.func @transform_20(%arg0: i32) -> (i32, i32, i32) {
    %c0_i32 = arith.constant 0 : i32
    %c0_i32_0 = arith.constant 0 : i32
    %c0_i32_1 = arith.constant 0 : i32
    %c0_i32_2 = arith.constant 0 : i32
    return %c0_i32, %c0_i32_0, %c0_i32_1 : i32, i32, i32
  }
  func.func @transform_21(%arg0: i32) -> (i32, i32, i32) {
    %c0_i32 = arith.constant 0 : i32
    %c0_i32_0 = arith.constant 0 : i32
    %c0_i32_1 = arith.constant 0 : i32
    %c0_i32_2 = arith.constant 0 : i32
    return %c0_i32, %c0_i32_0, %c0_i32_1 : i32, i32, i32
  }
  func.func @transform_22(%arg0: i32) -> (i32, i32, i32) {
    %c0_i32 = arith.constant 0 : i32
    %c0_i32_0 = arith.constant 0 : i32
    %c0_i32_1 = arith.constant 0 : i32
    %c0_i32_2 = arith.constant 0 : i32
    return %c0_i32, %c0_i32_0, %c0_i32_1 : i32, i32, i32
  }
  func.func @transform_23(%arg0: i32) -> (i32, i32, i32) {
    %c0_i32 = arith.constant 0 : i32
    %c0_i32_0 = arith.constant 0 : i32
    %c0_i32_1 = arith.constant 0 : i32
    %c0_i32_2 = arith.constant 0 : i32
    return %c0_i32, %c0_i32_0, %c0_i32_1 : i32, i32, i32
  }
  func.func @transform_24(%arg0: i32) -> (i32, i32, i32) {
    %c0_i32 = arith.constant 0 : i32
    %c0_i32_0 = arith.constant 0 : i32
    %c0_i32_1 = arith.constant 0 : i32
    %c0_i32_2 = arith.constant 0 : i32
    return %c0_i32, %c0_i32_0, %c0_i32_1 : i32, i32, i32
  }
  func.func @transform_25(%arg0: i32) -> (i32, i32, i32) {
    %c0_i32 = arith.constant 0 : i32
    %c0_i32_0 = arith.constant 0 : i32
    %c0_i32_1 = arith.constant 0 : i32
    %c0_i32_2 = arith.constant 0 : i32
    return %c0_i32, %c0_i32_0, %c0_i32_1 : i32, i32, i32
  }
  func.func @transform_26(%arg0: i32) -> (i32, i32) {
    %c0_i32 = arith.constant 0 : i32
    %c0_i32_0 = arith.constant 0 : i32
    %c0_i32_1 = arith.constant 0 : i32
    return %c0_i32, %c0_i32_0 : i32, i32
  }
  func.func @transform_27(%arg0: i32) -> (i32, i32) {
    %c0_i32 = arith.constant 0 : i32
    %c0_i32_0 = arith.constant 0 : i32
    %c0_i32_1 = arith.constant 0 : i32
    return %c0_i32, %c0_i32_0 : i32, i32
  }
  func.func @transform_28(%arg0: i32) -> (i32, i32, i32) {
    %c0_i32 = arith.constant 0 : i32
    %c0_i32_0 = arith.constant 0 : i32
    %c0_i32_1 = arith.constant 0 : i32
    return %arg0, %c0_i32, %c0_i32_0 : i32, i32, i32
  }
  func.func @transform_29(%arg0: i32) -> (i32, i32, i32) {
    %c0_i32 = arith.constant 0 : i32
    %c0_i32_0 = arith.constant 0 : i32
    %c0_i32_1 = arith.constant 0 : i32
    return %arg0, %c0_i32, %c0_i32_0 : i32, i32, i32
  }
}

</mosaic_0001>

<bundles_post_ra>
// kernel: bart_forward.2
= control target key start
LH: loop header
LB: loop body
LE: loop exit
PB: predicated region body
PF: predicated region fallthrough
CT: control target
= control target key end

     0   :  { %s1721_s21 = smov 0   ;;  %s1906_s0 = inlined_call_operand.vmem [shape: f32[2,8,32], index: 0, kind: input, shape index: {}]   ;;  %s1907_s1 = inlined_call_operand.vmem [shape: f32[2,1,8], index: 1, kind: input, shape index: {}]   ;;  %s1908_s2 = inlined_call_operand.vmem [shape: f32[1,32], index: 2, kind: input, shape index: {}]   ;;  %s1909_s3 = inlined_call_operand.vmem [shape: f32[1,32], index: 3, kind: input, shape index: {}]   ;;  %s1910_s4 = inlined_call_operand.vmem [shape: f32[1,32,96], index: 4, kind: input, shape index: {}]   ;;  %s1911_s5 = inlined_call_operand.vmem [shape: f32[1,1,96], index: 5, kind: input, shape index: {}]   ;;  %s1912_s6 = inlined_call_operand.vmem [shape: f32[1,32,32], index: 6, kind: input, shape index: {}]   ;;  %s1913_s7 = inlined_call_operand.vmem [shape: f32[1,1,32], index: 7, kind: input, shape index: {}, may-alias: {7,9,13,15}]   ;;  %s1914_s8 = inlined_call_operand.vmem [shape: f32[1,1,32], index: 8, kind: input, shape index: {}, may-alias: {8,14}]   ;;  %s1915_s9 = inlined_call_operand.vmem [shape: f32[1,1,32], index: 9, kind: input, shape index: {}, may-alias: {7,9,13,15}]   ;;  %s1916_s10 = inlined_call_operand.vmem [shape: f32[1,32,64], index: 10, kind: input, shape index: {}]   ;;  %s1917_s11 = inlined_call_operand.vmem [shape: f32[1,1,64], index: 11, kind: input, shape index: {}]   ;;  %s1918_s12 = inlined_call_operand.vmem [shape: f32[1,64,32], index: 12, kind: input, shape index: {}]   ;;  %s1919_s13 = inlined_call_operand.vmem [shape: f32[1,1,32], index: 13, kind: input, shape index: {}, may-alias: {7,9,13,15}]   ;;  %s1920_s14 = inlined_call_operand.vmem [shape: f32[1,1,32], index: 14, kind: input, shape index: {}, may-alias: {8,14}]   ;;  %s1921_s15 = inlined_call_operand.vmem [shape: f32[1,1,32], index: 15, kind: input, shape index: {}, may-alias: {7,9,13,15}]   ;;  %s1922_s16 = inlined_call_operand.vmem [shape: f32[2,8,32], index: 16, kind: output, shape index: {}]  }
   0x1   :  { %1923 = sst [smem:[#allocation2_spill]] %s1906_s0 }
   0x2 LB: > { %s1452_s22 = sadd.s32 4294967295, %s1627_s21   ;;  %p1456_p0 = scmp.ge.s32.totalorder %s1627_s21, 1  ;;  %s1627_s21 = sphi %s1721_s21, %s26_s21  }
   0x3   : > { %p469_p1 = scmp.lt.s32.totalorder %s1627_s21, 3 }
   0x5   : > { %p470_p2 = pnand %p1456_p0, %p469_p1 }
   0x6   : > { %p520_p3 = scmp.lt.s32.totalorder (!%p470_p2), %s1452_s22, 1  ;;  %s1924_s26 = sld [smem:[#allocation2_spill]] (!%p470_p2) }
   0x7   : > { %473 = sbr.rel (%p470_p2) target bundleno = 2426 (0x97a), region = 84  ;;  %s1631_s30 = smov (!%p470_p2), 96  }
   0x8   : > { %s1632_s0 = smov (!%p470_p2), 112   ;;  %s1633_s17 = smov (!%p470_p2), 80  }
   0x9   : > { %s1634_s24 = smov (!%p470_p2), 64   ;;  %s1635_s25 = smov (!%p470_p2), 48  }
   0xc   : > { %s1926_s22 = smov (!%p520_p3, %s1452_s22), 1  ;;  %vm537_vm0 = vcmask 261120   ;;  %v569_v7 = vld [vmem:[%s1910_s4 + $0x18] sm:$0xff]  ;;  %v1629_v8 = vmov 0.0   ;;  %v568_v9 = vld [vmem:[%s1910_s4 + $0x10] sm:$0xff]  ;;  %vm1630_vm1 = vmmov 0   ;;  %v657_v29 = vlaneseq }
   0xd   : > { %s1457_s23 = sshll.u32 %s1926_s22, 3  ;;  %1515 = vmatprep.subr.mxu0 %v1629_v8  ;;  %1523 = vmatprep.mubr.msk.f32.mxu0 %vm1630_vm1, %v1629_v8  ;;  %v567_v10 = vld [vmem:[%s1910_s4 + $0x8] sm:$0xff]  ;;  %v566_v11 = vld [vmem:[%s1910_s4] sm:$0xff]  ;;  %vm665_vm2 = vcmask 130048   ;;  %s526_s20 = scalar_lea.vmem %s1907_s1, %s1926_s22  ;;  %vm741_vm3 = vcmask 64512   ;;  %v653_v58 = vld [vmem:[%s1912_s6 + $0x18] sm:$0xff] }
   0xe   : > { %s523_s27 = scalar_lea.vmem %s1924_s26, %s1457_s23  ;;  %1516 = vmatpush3.msra.mxu0 %v569_v7  ;;  %1531 = vmatprep.subr.mxu1 %v1629_v8  ;;  %v1459_v16 = vld [vmem:[%s1908_s2] ss:$0 sm:$0xff]  ;;  %v658_v32 = vshrl.u32 %v657_v29, 7  ;;  %v651_v56 = vld [vmem:[%s1912_s6 + $0x8] sm:$0xff]  ;;  %v652_v59 = vld [vmem:[%s1912_s6 + $0x10] sm:$0xff]  ;;  %vm1285_vm4 = vcmask 523264   ;;  %s530_s26 = scalar_lea.vmem %s1922_s16, %s1457_s23 }
   0xf   : > { %v531_v0 = vld [vmem:[%s523_s27] sm:$0xff]  ;;  %1517 = vmatprep.subr.mxu0 %v1629_v8  ;;  %1533 = vmatprep.mubr.msk.f32.mxu1 %vm1630_vm1, %v1629_v8 }
  0x10   : > { %v538_v1 = vsel %vm537_vm0, %v531_v0, 0.0  ;;  %1518 = vmatpush3.msra.mxu0 %v568_v9  ;;  %v1460_v18 = vld [vmem:[%s1909_s3] ss:$0 sm:$0xff]  ;;  %v659_v34 = vsub.s32 0, %v658_v32 }
  0x11   : > { %539 = vadd.xlane.f32.xlu0 %v538_v1  ;;  %1519 = vmatprep.subr.mxu0 %v1629_v8  ;;  %v1461_v21 = vld [vmem:[%s1911_s5] ss:$0 sm:$0xff] }
  0x12   : > { %1520 = vmatpush3.msra.mxu0 %v567_v10  ;;  %v532_v30 = vld [vmem:[%s526_s20] sm:$0x1] }
  0x13   : > { %1521 = vmatprep.subr.mxu0 %v1629_v8  ;;  %v533_v31 = vsub.f32 1.0, %v532_v30  ;;  %v650_v57 = vld [vmem:[%s1912_s6] sm:$0xff] }
  0x14   : > { %1522 = vmatpush3.msra.mxu0 %v566_v11  ;;  %v1471_v9 = vld [vmem:[%s1913_s7] ss:$0 sm:$0xff] }
  0x15   : > { %1526 = vmatprep.subr.mxu0 %v1629_v8  ;;  %v534_v33 = vmul.f32 -1e+09, %v533_v31  ;;  %v1472_v29 = vld [vmem:[%s1914_s8] ss:$0 sm:$0xff] }
  0x16   : > { %v1473_v31 = vld [vmem:[%s1915_s9] ss:$0 sm:$0xff] }
  0x17   : > { %v660_v35 = vrot.slane %v534_v33, %v659_v34  ;;  %v1189_v34 = vld [vmem:[%s1918_s12 + $0x38] sm:$0xff] }
  0x9a   : > { %v540_v2 = vpop.xlane.xlu0 %539 }
  0x9b   : > { %v542_v3 = vmul.f32 0.03125, %v540_v2 }
  0x9d   : > { %v543_v4 = vsub.f32 %v531_v0, %v542_v3 }
  0x9f   : > { %v544_v5 = vmul.f32 %v543_v4, %v543_v4 }
  0xa1   : > { %v545_v6 = vsel %vm537_vm0, %v544_v5, 0.0 }
  0xa2   : > { %546 = vadd.xlane.f32.xlu0 %v545_v6 }
 0x12b   : > { %v547_v12 = vpop.xlane.xlu0 %546 }
 0x12c   : > { %v548_v13 = vmul.f32 0.03125, %v547_v12 }
 0x12e   : > { %v549_v14 = vadd.f32 1e-05, %v548_v13 }
 0x130   : > { %1605 = vrsqrt.f32 %v549_v14 }
 0x13d   : > { %v1606_v15 = vpop.eup %1605 }
 0x13e   : > { %v551_v17 = vmul.f32 %v1606_v15, %v543_v4 }
 0x140   : > { %v558_v19 = vmul.f32 %v1459_v16, %v551_v17 }
 0x142   : > { %v1767_v20 = vadd.f32 %v1460_v18, %v558_v19 }
 0x144   : > { %1524 = vmatmul.mubr.msk.f32.vlgmr.msra.gmra.mxu0 %vm537_vm0, %v1767_v20 }
 0x145   : > { %1528 = vmatprep.mubr.msk.f32.mxu0 %vm1630_vm1, %v1629_v8 }
 0x204   : > { %v646_v22 = vpop.f32.mrf.mxu0 }
 0x205   : > { %v647_v23 = vadd.f32 %v1461_v21, %v646_v22  ;;  %v1180_v22 = vld [vmem:[%s1916_s10 + $0x18] sm:$0xff] }
 0x206   : > { %v1525_v24 = vpop.f32.mrf.mxu0 }
 0x207   : > { %663 = vrot.lane.b32.xlu1 %v647_v23, %s1631_s30  ;;  %v655_v25 = vmul.f32 0.25, %v647_v23  ;;  %v1177_v24 = vld [vmem:[%s1916_s10] sm:$0xff] }
 0x209   : > { %829 = vrot.lane.b32.xlu0 %v655_v25, %s1632_s0 }
 0x20b   : > { %831 = vrot.lane.b32.xlu1 %v647_v23, %s1633_s17 }
 0x279   : > { %v664_v26 = vpop.permute.xlu1 %663 }
 0x27a   : > { %1527 = vmatpush3.xpose.msk.msra.mxu0 %vm665_vm2, %v664_v26 }
 0x27b   : > { %1536 = vmatprep.subr.mxu0 %v1629_v8  ;;  %v830_v28 = vpop.permute.xlu0 %829 }
 0x27d   : > { %v832_v27 = vpop.permute.xlu1 %831  ;;  %1529 = vmatmul.mubr.msk.f32.vlgmr.msra.gmra.mxu0 %vm665_vm2, %v655_v25 }
 0x27e   : > { %1537 = vmatpush3.xpose.msk.msra.mxu0 %vm665_vm2, %v832_v27  ;;  %1538 = vmatprep.mubr.msk.f32.mxu0 %vm1630_vm1, %v1629_v8 }
 0x27f   : > { %1546 = vmatprep.subr.mxu0 %v1629_v8 }
 0x281   : > { %1539 = vmatmul.mubr.msk.f32.vlgmr.msra.gmra.mxu0 %vm665_vm2, %v830_v28 }
 0x282   : > { %1550 = vmatprep.mubr.msk.f32.mxu0 %vm1630_vm1, %v1629_v8  ;;  %1547 = vmatpush3.msra.mxu0 %v653_v58 }
 0x283   : > { %1548 = vmatprep.subr.mxu0 %v1629_v8 }
 0x284   : > { %1549 = vmatpush3.msra.mxu0 %v652_v59 }
 0x285   : > { %1560 = vmatprep.subr.mxu0 %v1629_v8 }
 0x33d   : > { %v737_v36 = vpop.f32.mrf.mxu0 }
 0x33e   : > { %v738_v37 = vadd.f32 %v737_v36, %v660_v35  ;;  %v1187_v36 = vld [vmem:[%s1918_s12 + $0x28] sm:$0xff] }
 0x33f   : > { %v1530_v38 = vpop.f32.mrf.mxu0 }
 0x340   : > { %v742_v39 = vsel %vm741_vm3, %v738_v37, -inf  ;;  %v1185_v38 = vld [vmem:[%s1918_s12 + $0x18] sm:$0xff] }
 0x341   : > { %743 = vmax.xlane.f32.xlu1 %v742_v39  ;;  %v903_v40 = vpop.f32.mrf.mxu0  ;;  %v1184_v39 = vld [vmem:[%s1918_s12 + $0x10] sm:$0xff] }
 0x342   : > { %v904_v41 = vadd.f32 %v903_v40, %v660_v35  ;;  %v1188_v35 = vld [vmem:[%s1918_s12 + $0x30] sm:$0xff]  ;;  %v1183_v40 = vld [vmem:[%s1918_s12 + $0x8] sm:$0xff] }
 0x343   : > { %v1540_v42 = vpop.f32.mrf.mxu0 }
 0x344   : > { %v907_v43 = vsel %vm741_vm3, %v904_v41, -inf  ;;  %v1474_v42 = vld [vmem:[%s1917_s11] ss:$0 sm:$0xff] }
 0x345   : > { %908 = vmax.xlane.f32.xlu0 %v907_v43 }
 0x352   : > { %751 = vrot.lane.b32.xlu1 %v647_v23, %s1634_s24 }
 0x35b   : > { %916 = vrot.lane.b32.xlu0 %v647_v23, %s1635_s25  ;;  %v1179_v23 = vld [vmem:[%s1916_s10 + $0x10] sm:$0xff] }
 0x3ca   : > { %v744_v44 = vpop.xlane.xlu1 %743 }
 0x3cb   : > { %v745_v45 = vsub.f32 %v738_v37, %v744_v44  ;;  %v1186_v37 = vld [vmem:[%s1918_s12 + $0x20] sm:$0xff] }
 0x3cd   : > { %v746_v46 = vmul.f32 1.442695, %v745_v45 }
 0x3ce   : > { %v752_v47 = vpop.permute.xlu1 %751  ;;  %v909_v48 = vpop.xlane.xlu0 %908 }
 0x3cf   : > { %1607 = vpow2.f32 %v746_v46  ;;  %v910_v49 = vsub.f32 %v904_v41, %v909_v48  ;;  %1532 = vmatpush3.msra.mxu1 %v752_v47  ;;  %v1182_v41 = vld [vmem:[%s1918_s12] sm:$0xff] }
 0x3d0   : > { %1541 = vmatprep.subr.mxu1 %v1629_v8 }
 0x3d1   : > { %v911_v50 = vmul.f32 1.442695, %v910_v49 }
 0x3d2   : > { %v917_v52 = vpop.permute.xlu0 %916 }
 0x3d3   : > { %1609 = vpow2.f32 %v911_v50 }
 0x3dc   : > { %v1608_v51 = vpop.eup %1607 }
 0x3dd   : > { %1534 = vmatmul.mubr.msk.f32.vlgmr.msra.gmra.mxu1 %vm741_vm3, %v1608_v51  ;;  %v748_v53 = vsel %vm741_vm3, %v1608_v51, 0.0 }
 0x3de   : > { %1542 = vmatpush3.msra.mxu1 %v917_v52  ;;  %749 = vadd.xlane.f32.xlu1 %v748_v53 }
 0x3df   : > { %1543 = vmatprep.mubr.msk.f32.mxu1 %vm1630_vm1, %v1629_v8  ;;  %1553 = vmatprep.subr.mxu1 %v1629_v8 }
 0x3e0   : > { %v1610_v54 = vpop.eup %1609 }
 0x3e1   : > { %1544 = vmatmul.mubr.msk.f32.vlgmr.msra.gmra.mxu1 %vm741_vm3, %v1610_v54  ;;  %v913_v55 = vsel %vm741_vm3, %v1610_v54, 0.0 }
 0x3e2   : > { %914 = vadd.xlane.f32.xlu0 %v913_v55  ;;  %1557 = vmatprep.mubr.msk.f32.mxu1 %vm1630_vm1, %v1629_v8 }
 0x3e3   : > { %1554 = vmatpush3.msra.mxu1 %v651_v56 }
 0x3e4   : > { %1555 = vmatprep.subr.mxu1 %v1629_v8 }
 0x3e5   : > { %1556 = vmatpush3.msra.mxu1 %v650_v57 }
 0x3e6   : > { %1571 = vmatprep.subr.mxu1 %v1629_v8 }
 0x467   : > { %v750_v60 = vpop.xlane.xlu1 %749 }
 0x468   : > { %1611 = vrcp.f32 %v750_v60 }
 0x46b   : > { %v915_v61 = vpop.xlane.xlu0 %914 }
 0x46c   : > { %1613 = vrcp.f32 %v915_v61 }
 0x475   : > { %v1612_v62 = vpop.eup %1611 }
 0x479   : > { %v1614_v2 = vpop.eup %1613 }
 0x49d   : > { %v823_v63 = vpop.f32.mrf.mxu1 }
 0x49e   : > { %v828_v0 = vmul.f32 %v1612_v62, %v823_v63 }
 0x49f   : > { %v1535_v1 = vpop.f32.mrf.mxu1 }
 0x4a0   : > { %1558 = vmatmul.mubr.msk.f32.vlgmr.msra.gmra.mxu1 %vm665_vm2, %v828_v0 }
 0x4a1   : > { %v988_v3 = vpop.f32.mrf.mxu1  ;;  %1587 = vmatprep.mubr.msk.f32.mxu1 %vm1630_vm1, %v1629_v8  ;;  %1572 = vmatpush3.msra.mxu1 %v1189_v34 }
 0x4a2   : > { %v993_v4 = vmul.f32 %v1614_v2, %v988_v3  ;;  %1573 = vmatprep.subr.mxu1 %v1629_v8 }
 0x4a3   : > { %v1545_v5 = vpop.f32.mrf.mxu1  ;;  %1574 = vmatpush3.msra.mxu1 %v1188_v35 }
 0x4a4   : > { %1551 = vmatmul.mubr.msk.f32.vlgmr.msra.gmra.mxu0 %vm665_vm2, %v993_v4  ;;  %1575 = vmatprep.subr.mxu1 %v1629_v8  ;;  %v1478_v5 = vld [vmem:[%s1920_s14] ss:$0 sm:$0xff] }
 0x4a5   : > { %1568 = vmatprep.mubr.msk.f32.mxu0 %vm1630_vm1, %v1629_v8  ;;  %1561 = vmatpush3.msra.mxu0 %v1180_v22 }
 0x4a6   : > { %1562 = vmatprep.subr.mxu0 %v1629_v8  ;;  %1576 = vmatpush3.msra.mxu1 %v1187_v36 }
 0x4a7   : > { %1563 = vmatpush3.msra.mxu0 %v1179_v23  ;;  %1577 = vmatprep.subr.mxu1 %v1629_v8 }
 0x4a8   : > { %1564 = vmatprep.subr.mxu0 %v1629_v8  ;;  %1578 = vmatpush3.msra.mxu1 %v1186_v37 }
 0x4a9   : > { %1579 = vmatprep.subr.mxu1 %v1629_v8 }
 0x4aa   : > { %1580 = vmatpush3.msra.mxu1 %v1185_v38 }
 0x4ab   : > { %1581 = vmatprep.subr.mxu1 %v1629_v8 }
 0x4ac   : > { %1582 = vmatpush3.msra.mxu1 %v1184_v39 }
 0x4ad   : > { %1583 = vmatprep.subr.mxu1 %v1629_v8 }
 0x4ae   : > { %1584 = vmatpush3.msra.mxu1 %v1183_v40 }
 0x4af   : > { %1585 = vmatprep.subr.mxu1 %v1629_v8 }
 0x4b0   : > { %1586 = vmatpush3.msra.mxu1 %v1182_v41 }
 0x560   : > { %v1136_v6 = vpop.f32.mrf.mxu1 }
 0x562   : > { %v1559_v7 = vpop.f32.mrf.mxu1 }
 0x563   : > { %v1479_v7 = vld [vmem:[%s1921_s15] ss:$0 sm:$0xff] }
 0x564   : > { %v1063_v10 = vpop.f32.mrf.mxu0 }
 0x565   : > { %v1137_v11 = vadd.f32 %v1136_v6, %v1063_v10 }
 0x566   : > { %v1552_v12 = vpop.f32.mrf.mxu0 }
 0x567   : > { %v1146_v13 = vadd.f32 %v1471_v9, %v1137_v11 }
 0x569   : > { %v1147_v14 = vadd.f32 %v1146_v13, %v1767_v20  ;;  %v1178_v20 = vld [vmem:[%s1916_s10 + $0x8] sm:$0xff] }
 0x56a   : > { %1565 = vmatpush3.msra.mxu0 %v1178_v20 }
 0x56b   : > { %v1150_v15 = vsel %vm537_vm0, %v1147_v14, 0.0  ;;  %1566 = vmatprep.subr.mxu0 %v1629_v8  ;;  %v1476_v8 = vld [vmem:[%s1919_s13] ss:$0 sm:$0xff] }
 0x56c   : > { %1151 = vadd.xlane.f32.xlu1 %v1150_v15  ;;  %1567 = vmatpush3.msra.mxu0 %v1177_v24 }
 0x5f5   : > { %v1152_v16 = vpop.xlane.xlu1 %1151 }
 0x5f6   : > { %v1153_v17 = vmul.f32 0.03125, %v1152_v16 }
 0x5f8   : > { %v1154_v18 = vsub.f32 %v1147_v14, %v1153_v17 }
 0x5fa   : > { %v1155_v19 = vmul.f32 %v1154_v18, %v1154_v18 }
 0x5fc   : > { %v1156_v21 = vsel %vm537_vm0, %v1155_v19, 0.0 }
 0x5fd   : > { %1157 = vadd.xlane.f32.xlu1 %v1156_v21 }
 0x686   : > { %v1158_v25 = vpop.xlane.xlu1 %1157 }
 0x687   : > { %v1159_v26 = vmul.f32 0.03125, %v1158_v25 }
 0x689   : > { %v1160_v27 = vadd.f32 1e-05, %v1159_v26 }
 0x68b   : > { %1615 = vrsqrt.f32 %v1160_v27 }
 0x698   : > { %v1616_v28 = vpop.eup %1615 }
 0x699   : > { %v1162_v30 = vmul.f32 %v1616_v28, %v1154_v18 }
 0x69b   : > { %v1169_v32 = vmul.f32 %v1472_v29, %v1162_v30 }
 0x69d   : > { %v1176_v33 = vadd.f32 %v1473_v31, %v1169_v32 }
 0x69f   : > { %1569 = vmatmul.mubr.msk.f32.vlgmr.msra.gmra.mxu0 %vm537_vm0, %v1176_v33 }
 0x75f   : > { %v1266_v43 = vpop.f32.mrf.mxu0 }
 0x760   : > { %v1267_v44 = vadd.f32 %v1474_v42, %v1266_v43 }
 0x761   : > { %v1570_v45 = vpop.f32.mrf.mxu0 }
 0x762   : > { %v1270_v46 = vmul.f32 %v1267_v44, %v1267_v44 }
 0x764   : > { %v1271_v47 = vmul.f32 %v1270_v46, %v1267_v44 }
 0x766   : > { %v1272_v48 = vmul.f32 0.044715, %v1271_v47 }
 0x768   : > { %v1273_v49 = vadd.f32 %v1272_v48, %v1267_v44 }
 0x76a   : > { %v1274_v50 = vmul.f32 0.7978846, %v1273_v49 }
 0x76c   : > { %1617 = vtanh.f32 %v1274_v50 }
 0x779   : > { %v1618_v51 = vpop.eup %1617 }
 0x77a   : > { %v1276_v52 = vadd.f32 1.0, %v1618_v51 }
 0x77c   : > { %v1277_v53 = vmul.f32 0.5, %v1276_v52 }
 0x77e   : > { %v1278_v54 = vmul.f32 %v1277_v53, %v1267_v44 }
 0x780   : > { %1588 = vmatmul.mubr.msk.f32.vlgmr.msra.gmra.mxu1 %vm1285_vm4, %v1278_v54 }
 0x840   : > { %v1355_v55 = vpop.f32.mrf.mxu1 }
 0x841   : > { %v1356_v56 = vadd.f32 %v1476_v8, %v1355_v55 }
 0x842   : > { %v1589_v57 = vpop.f32.mrf.mxu1 }
 0x843   : > { %v1359_v58 = vadd.f32 %v1356_v56, %v1176_v33 }
 0x845   : > { %v1362_v59 = vsel %vm537_vm0, %v1359_v58, 0.0 }
 0x846   : > { %1363 = vadd.xlane.f32.xlu1 %v1362_v59 }
 0x8cf   : > { %v1364_v60 = vpop.xlane.xlu1 %1363 }
 0x8d0   : > { %v1365_v61 = vmul.f32 0.03125, %v1364_v60 }
 0x8d2   : > { %v1366_v62 = vsub.f32 %v1359_v58, %v1365_v61 }
 0x8d4   : > { %v1367_v63 = vmul.f32 %v1366_v62, %v1366_v62 }
 0x8d6   : > { %v1368_v0 = vsel %vm537_vm0, %v1367_v63, 0.0 }
 0x8d7   : > { %1369 = vadd.xlane.f32.xlu1 %v1368_v0 }
 0x960   : > { %v1370_v1 = vpop.xlane.xlu1 %1369 }
 0x961   : > { %v1371_v2 = vmul.f32 0.03125, %v1370_v1 }
 0x963   : > { %v1372_v3 = vadd.f32 1e-05, %v1371_v2 }
 0x965   : > { %1619 = vrsqrt.f32 %v1372_v3 }
 0x972   : > { %v1620_v4 = vpop.eup %1619 }
 0x973   : > { %v1374_v6 = vmul.f32 %v1620_v4, %v1366_v62 }
 0x975   : > { %v1381_v9 = vmul.f32 %v1478_v5, %v1374_v6 }
 0x977   : > { %v1388_v10 = vadd.f32 %v1479_v7, %v1381_v9 }
 0x979   : > { %1389 = vst.msk [vmem:[%s530_s26] sm:$0xff] %vm537_vm0, %v1388_v10 }
 0x97a PF: > { %s26_s21 = sadd.s32 1, %s1627_s21  }
 0x97b   : > { %p23_p4 = scmp.ge.s32.totalorder %s26_s21, 4  }
 0x97d   :  { %25 = sbr.rel (!%p23_p4) target bundleno = 2 (0x2), region = 117 }

// kernel: bart_forward.3
= control target key start
LH: loop header
LB: loop body
LE: loop exit
PB: predicated region body
PF: predicated region fallthrough
CT: control target
= control target key end

     0   :  { %s3216_s6 = smov 1   ;;  %s3217_s10 = smov 2   ;;  %s3709_s0 = inlined_call_operand.smem [shape: u32[30], index: -1, kind: input, shape index: {}] }
   0x1   :  { %s3263_s5 = sld [smem:[%s3709_s0]]   ;;  %s3218_s14 = smov 3  }
   0x2   :  { %s3268_s9 = sld [smem:[%s3709_s0 + %s3216_s6]]   ;;  %s3219_s18 = smov 4  }
   0x3   :  { %s3273_s13 = sld [smem:[%s3709_s0 + %s3217_s10]]   ;;  %s3220_s22 = smov 5  }
   0x4   :  { %s3278_s17 = sld [smem:[%s3709_s0 + %s3218_s14]]   ;;  %s3221_s26 = smov 6  }
   0x5   :  { %s3283_s21 = sld [smem:[%s3709_s0 + %s3219_s18]]   ;;  %s3222_s30 = smov 7  }
   0x6   :  { %s3288_s25 = sld [smem:[%s3709_s0 + %s3220_s22]]   ;;  %s3223_s4 = smov 8  }
   0x7   :  { %3719 = sst [smem:[#allocation5_spill]] %s3263_s5  ;;  %s3224_s10 = smov 9  }
   0x8   :  { %3720 = sst [smem:[#allocation6_spill]] %s3268_s9  ;;  %s3225_s15 = smov 10  }
   0x9   :  { %3721 = sst [smem:[#allocation7_spill]] %s3273_s13  ;;  %s3226_s20 = smov 11  }
   0xa   :  { %3722 = sst [smem:[#allocation8_spill]] %s3278_s17  ;;  %s3228_s1 = smov 13  }
   0xb   :  { %s3293_s29 = sld [smem:[%s3709_s0 + %s3221_s26]]   ;;  %s3227_s26 = smov 12  }
   0xc   :  { %s3298_s3 = sld [smem:[%s3709_s0 + %s3222_s30]]   ;;  %s3229_s7 = smov 14  }
   0xd   :  { %s3303_s8 = sld [smem:[%s3709_s0 + %s3223_s4]]   ;;  %s3231_s22 = smov 16  }
   0xe   :  { %s3308_s14 = sld [smem:[%s3709_s0 + %s3224_s10]]   ;;  %s3232_s28 = smov 17  }
   0xf   :  { %s3313_s19 = sld [smem:[%s3709_s0 + %s3225_s15]]   ;;  %s3230_s15 = smov 15  }
  0x10   :  { %s3318_s24 = sld [smem:[%s3709_s0 + %s3226_s20]]  }
  0x11   :  { %s3323_s30 = sld [smem:[%s3709_s0 + %s3227_s26]]  }
  0x12   :  { %3723 = sst [smem:[#allocation9_spill]] %s3298_s3 }
  0x13   :  { %3724 = sst [smem:[#allocation10_spill]] %s3303_s8 }
  0x14   :  { %3725 = sst [smem:[#allocation11_spill]] %s3308_s14 }
  0x15   :  { %s3328_s6 = sld [smem:[%s3709_s0 + %s3228_s1]]  }
  0x16   :  { %s3333_s12 = sld [smem:[%s3709_s0 + %s3229_s7]]   ;;  %s3233_s7 = smov 18  }
  0x17   :  { %s3338_s20 = sld [smem:[%s3709_s0 + %s3230_s15]]   ;;  %s3234_s15 = smov 19  }
  0x18   :  { %s3343_s27 = sld [smem:[%s3709_s0 + %s3231_s22]]   ;;  %s3235_s22 = smov 20  }
  0x19   :  { %s3348_s4 = sld [smem:[%s3709_s0 + %s3232_s28]]   ;;  %s3236_s28 = smov 21  }
  0x1a   :  { %s3353_s17 = sld [smem:[%s3709_s0 + %s3233_s7]]   ;;  %s3237_s7 = smov 22  }
  0x1b   :  { %3726 = sst [smem:[#allocation12_spill]] %s3328_s6 }
  0x1c   :  { %3727 = sst [smem:[#allocation13_spill]] %s3333_s12 }
  0x1d   :  { %s3358_s13 = sld [smem:[%s3709_s0 + %s3234_s15]]   ;;  %s3238_s15 = smov 23  }
  0x1e   :  { %3728 = sst [smem:[#allocation14_spill]] %s3343_s27 }
  0x1f   :  { %3729 = sst [smem:[#allocation15_spill]] %s3348_s4 }
  0x20   :  { %3730 = sst [smem:[#allocation16_spill]] %s3353_s17 }
  0x21   :  { %s3363_s27 = sld [smem:[%s3709_s0 + %s3235_s22]]   ;;  %s3239_s22 = smov 24  }
  0x22   :  { %s3368_s4 = sld [smem:[%s3709_s0 + %s3236_s28]]   ;;  %s3240_s28 = smov 25  }
  0x23   :  { %3731 = sst [smem:[#allocation17_spill]] %s3358_s13 }
  0x24   :  { %s3373_s17 = sld [smem:[%s3709_s0 + %s3237_s7]]   ;;  %s3241_s7 = smov 26  }
  0x25   :  { %s3378_s13 = sld [smem:[%s3709_s0 + %s3238_s15]]   ;;  %s3242_s15 = smov 27  }
  0x27   :  { %3732 = sst [smem:[#allocation18_spill]] %s3363_s27 }
  0x28   :  { %3733 = sst [smem:[#allocation19_spill]] %s3368_s4 }
  0x29   :  { %s3383_s27 = sld [smem:[%s3709_s0 + %s3239_s22]]   ;;  %s3243_s22 = smov 28  }
  0x2a   :  { %3734 = sst [smem:[#allocation20_spill]] %s3373_s17 }
  0x2b   :  { %3735 = sst [smem:[#allocation21_spill]] %s3378_s13 }
  0x2c   :  { %s3388_s4 = sld [smem:[%s3709_s0 + %s3240_s28]]   ;;  %s3244_s28 = smov 29  }
  0x2d   :  { %s3393_s17 = sld [smem:[%s3709_s0 + %s3241_s7]]  }
  0x2e   :  { %s3398_s13 = sld [smem:[%s3709_s0 + %s3242_s15]]  }
  0x2f   :  { %3736 = sst [smem:[#allocation22_spill]] %s3383_s27 }
  0x30   :  { %s3403_s27 = sld [smem:[%s3709_s0 + %s3243_s22]]  }
  0x32   :  { %3737 = sst [smem:[#allocation23_spill]] %s3388_s4 }
  0x33   :  { %3738 = sst [smem:[#allocation24_spill]] %s3393_s17 }
  0x34   :  { %3739 = sst [smem:[#allocation25_spill]] %s3398_s13 }
  0x35   :  { %s3408_s4 = sld [smem:[%s3709_s0 + %s3244_s28]]  }
  0x36   :  { %65 = vsyncpa [#allocation3], 0 }
  0x37   :  { %67 = vsyncpa [#allocation3 + $0x1], 0  ;;  %s3410_s7 = smov 0   ;;  %s3412_s10 = smov 0  }
  0x38   :  { %s3414_s11 = smov 0   ;;  %s3416_s15 = smov 0  }
  0x39 LB: > { %s3740_s17 = sld [smem:[#allocation24_spill]]  ;;  %s3431_s0 = sadd.s32 4294967295, %s3214_s15   ;;  %s3210_s11 = sphi %s3414_s11, %s3767_s11   ;;  %s3206_s10 = sphi %s3412_s10, %s3766_s10   ;;  %s3202_s7 = sphi %s3410_s7, %s3765_s7   ;;  %s3214_s15 = sphi %s3416_s15, %s3768_s15  }
  0x3a   : > { %s3741_s12 = sld [smem:[#allocation13_spill]]  ;;  %s2788_s16 = sadd.s32 4294967294, %s3214_s15  }
  0x3b   : > { %s3742_s8 = sld [smem:[#allocation10_spill]]  ;;  %s3435_s18 = sadd.s32 1, %s3214_s15  }
  0x3c   : > { %s688_s22 = sadd.s32 1, %s3210_s11  ;;  %s685_s23 = ssub.s32 %s3214_s15, %s3435_s18 }
  0x3d   : > { %p698_p0 = scmp.ne.s32.totalorder %s3210_s11, %s3206_s10  ;;  %p686_p1 = scmp.eq.s32.totalorder %s685_s23, 0 }
  0x3e   : > { %p699_p2 = scmp.eq.s32.totalorder %s3431_s0, 1  ;;  %p704_p3 = scmp.ne.s32.totalorder %s3206_s10, %s3202_s7 }
  0x3f   : > { %p705_p4 = scmp.eq.s32.totalorder %s2788_s16, 1  ;;  %p2791_p7 = scmp.ge.s32.totalorder %s3214_s15, 1 }
  0x40   : > { %s3446_s26 = scalar_select %p686_p1, %s3210_s11, %s688_s22  }
  0x41   : > { %p3448_p5 = por %p699_p2, %p698_p0  ;;  %p3452_p6 = por %p705_p4, %p704_p3 }
  0x42   : > { %p848_p8 = scmp.lt.s32.totalorder %s3214_s15, 3 }
  0x44   : > { %p849_p9 = pnand %p2791_p7, %p848_p8 }
  0x45   : > { %s3745_s5 = sld [smem:[#allocation5_spill]] (!%p849_p9)  ;;  %p938_p10 = scmp.lt.s32.totalorder (!%p849_p9), %s3431_s0, 1 }
  0x46   : > { %852 = sbr.rel (%p849_p9) target bundleno = 4510 (0x119e), region = 132  ;;  %s3746_s3 = sld [smem:[#allocation9_spill]] (!%p849_p9) }
  0x47   : > { %s3714_s23 = smov (!%p849_p9), 96   ;;  %s3747_s14 = sld [smem:[#allocation11_spill]] (!%p849_p9) }
  0x48   : > { %s3748_s9 = sld [smem:[#allocation6_spill]] (!%p849_p9) }
  0x49   : > { %s3749_s6 = sld [smem:[#allocation12_spill]] (!%p849_p9) }
  0x4a   : > { %s3763_s13 = sld [smem:[#allocation25_spill]] (!%p849_p9) }
  0x4b   : > { %s3460_s2 = scalar_select %p938_p10, %s3431_s0, 1  ;;  %vm971_vm0 = vcmask 261120   ;;  %v1003_v7 = vld [vmem:[%s3293_s29 + $0x18] sm:$0xff]  ;;  %v3245_v8 = vmov 0.0   ;;  %v1002_v9 = vld [vmem:[%s3293_s29 + $0x10] sm:$0xff]  ;;  %vm3246_vm1 = vmmov 0   ;;  %v963_v29 = vlaneseq }
  0x4c   : > { %2903 = vmatprep.subr.mxu0 %v3245_v8  ;;  %2911 = vmatprep.mubr.msk.f32.mxu0 %vm3246_vm1, %v3245_v8  ;;  %v1001_v10 = vld [vmem:[%s3293_s29 + $0x8] sm:$0xff]  ;;  %v1000_v11 = vld [vmem:[%s3293_s29] sm:$0xff]  ;;  %vm1093_vm2 = vcmask 130048   ;;  %v3250_v32 = vmov -1e+09   ;;  %vm1169_vm4 = vcmask 64512  }
  0x4d   : > { %s3463_s16 = sshll.u32 %s3460_s2, 3  ;;  %2904 = vmatpush3.msra.mxu0 %v1003_v7  ;;  %2914 = vmatprep.subr.mxu1 %v3245_v8  ;;  %v2797_v16 = vld [vmem:[%s3283_s21] ss:$0 sm:$0xff]  ;;  %v3505_v30 = vshrl.u32 %v963_v29, 7  ;;  %v3507_v31 = vand.u32 127, %v963_v29  ;;  %v1085_v54 = vld [vmem:[%s3742_s8 + $0x8] sm:$0xff] }
  0x4e   : > { %s941_s22 = scalar_lea.vmem %s3745_s5, %s3463_s16  ;;  %2905 = vmatprep.subr.mxu0 %v3245_v8  ;;  %2916 = vmatprep.mubr.msk.f32.mxu1 %vm3246_vm1, %v3245_v8  ;;  %v2798_v18 = vld [vmem:[%s3288_s25] ss:$0 sm:$0xff]  ;;  %s3713_s5 = smov 80   ;;  %v1087_v56 = vld [vmem:[%s3742_s8 + $0x18] sm:$0xff]  ;;  %v1086_v57 = vld [vmem:[%s3742_s8 + $0x10] sm:$0xff]  ;;  %vm2404_vm5 = vcmask 523264  }
  0x4f   : > { %v957_v0 = vld [vmem:[%s941_s22] sm:$0xff]  ;;  %2906 = vmatpush3.msra.mxu0 %v1002_v9  ;;  %s3248_s22 = smov 112   ;;  %vm967_vm3 = vcmp.le.s32.totalorder %v3507_v31, %v3505_v30 }
  0x50   : > { %v972_v1 = vsel %vm971_vm0, %v957_v0, 0.0  ;;  %2907 = vmatprep.subr.mxu0 %v3245_v8  ;;  %v2799_v21 = vld [vmem:[%s3746_s3] ss:$0 sm:$0xff]  ;;  %v968_v33 = vsel %vm967_vm3, 0.0, %v3250_v32  ;;  %s3758_s3 = sld [smem:[#allocation20_spill]] }
  0x51   : > { %973 = vadd.xlane.f32.xlu0 %v972_v1  ;;  %2908 = vmatpush3.msra.mxu0 %v1001_v10  ;;  %v1084_v55 = vld [vmem:[%s3742_s8] sm:$0xff] }
  0x52   : > { %2909 = vmatprep.subr.mxu0 %v3245_v8 }
  0x53   : > { %2910 = vmatpush3.msra.mxu0 %v1000_v11 }
  0x54   : > { %2924 = vmatprep.subr.mxu0 %v3245_v8 }
  0xda   : > { %v974_v2 = vpop.xlane.xlu0 %973 }
  0xdb   : > { %v976_v3 = vmul.f32 0.03125, %v974_v2 }
  0xdd   : > { %v977_v4 = vsub.f32 %v957_v0, %v976_v3 }
  0xdf   : > { %v978_v5 = vmul.f32 %v977_v4, %v977_v4 }
  0xe1   : > { %v979_v6 = vsel %vm971_vm0, %v978_v5, 0.0 }
  0xe2   : > { %980 = vadd.xlane.f32.xlu0 %v979_v6  ;;  %v2809_v6 = vld [vmem:[%s3747_s14] ss:$0 sm:$0xff] }
 0x16b   : > { %v981_v12 = vpop.xlane.xlu0 %980 }
 0x16c   : > { %v982_v13 = vmul.f32 0.03125, %v981_v12 }
 0x16e   : > { %v983_v14 = vadd.f32 1e-05, %v982_v13 }
 0x170   : > { %3124 = vrsqrt.f32 %v983_v14 }
 0x17d   : > { %v3125_v15 = vpop.eup %3124 }
 0x17e   : > { %v985_v17 = vmul.f32 %v3125_v15, %v977_v4 }
 0x180   : > { %v992_v19 = vmul.f32 %v2797_v16, %v985_v17 }
 0x182   : > { %v3485_v20 = vadd.f32 %v2798_v18, %v992_v19  ;;  %v1692_v19 = vld [vmem:[%s3741_s12 + $0x18] sm:$0xff] }
 0x184   : > { %2912 = vmatmul.mubr.msk.f32.vlgmr.msra.gmra.mxu0 %vm971_vm0, %v3485_v20 }
 0x185   : > { %2926 = vmatprep.mubr.msk.f32.mxu0 %vm3246_vm1, %v3245_v8 }
 0x244   : > { %v1080_v22 = vpop.f32.mrf.mxu0 }
 0x245   : > { %v1081_v23 = vadd.f32 %v2799_v21, %v1080_v22  ;;  %v1608_v21 = vld [vmem:[%s3323_s30 + $0x18] sm:$0xff]  ;;  %v1690_v22 = vld [vmem:[%s3741_s12 + $0x8] sm:$0xff] }
 0x246   : > { %v2913_v24 = vpop.f32.mrf.mxu0 }
 0x247   : > { %1091 = vrot.lane.b32.xlu1 %v1081_v23, %s3714_s23  ;;  %v1089_v25 = vmul.f32 0.25, %v1081_v23  ;;  %s3252_s23 = smov 48   ;;  %v1689_v24 = vld [vmem:[%s3741_s12] sm:$0xff] }
 0x249   : > { %1257 = vrot.lane.b32.xlu0 %v1089_v25, %s3248_s22 }
 0x24b   : > { %1259 = vrot.lane.b32.xlu1 %v1081_v23, %s3713_s5  ;;  %s3251_s5 = smov 64  }
 0x2b9   : > { %v1092_v26 = vpop.permute.xlu1 %1091 }
 0x2ba   : > { %2915 = vmatpush3.xpose.msk.msra.mxu1 %vm1093_vm2, %v1092_v26 }
 0x2bb   : > { %2919 = vmatprep.subr.mxu1 %v3245_v8  ;;  %v1258_v28 = vpop.permute.xlu0 %1257 }
 0x2bd   : > { %v1260_v27 = vpop.permute.xlu1 %1259  ;;  %2917 = vmatmul.mubr.msk.f32.vlgmr.msra.gmra.mxu1 %vm1093_vm2, %v1089_v25  ;;  %v1606_v25 = vld [vmem:[%s3323_s30 + $0x8] sm:$0xff] }
 0x2be   : > { %2925 = vmatpush3.xpose.msk.msra.mxu0 %vm1093_vm2, %v1260_v27  ;;  %2921 = vmatprep.mubr.msk.f32.mxu1 %vm3246_vm1, %v3245_v8  ;;  %v1605_v27 = vld [vmem:[%s3323_s30] sm:$0xff] }
 0x2bf   : > { %2934 = vmatprep.subr.mxu0 %v3245_v8 }
 0x2c1   : > { %2927 = vmatmul.mubr.msk.f32.vlgmr.msra.gmra.mxu0 %vm1093_vm2, %v1258_v28 }
 0x2c2   : > { %2938 = vmatprep.mubr.msk.f32.mxu0 %vm3246_vm1, %v3245_v8  ;;  %2935 = vmatpush3.msra.mxu0 %v1087_v56 }
 0x2c3   : > { %2936 = vmatprep.subr.mxu0 %v3245_v8 }
 0x2c4   : > { %2937 = vmatpush3.msra.mxu0 %v1086_v57 }
 0x2c5   : > { %2948 = vmatprep.subr.mxu0 %v3245_v8 }
 0x37d   : > { %v1165_v34 = vpop.f32.mrf.mxu1 }
 0x37e   : > { %v1166_v35 = vadd.f32 %v1165_v34, %v968_v33  ;;  %v2810_v34 = vld [vmem:[%s3313_s19] ss:$0 sm:$0xff] }
 0x37f   : > { %v2918_v36 = vpop.f32.mrf.mxu1 }
 0x380   : > { %v1170_v37 = vsel %vm1169_vm4, %v1166_v35, -inf  ;;  %v2811_v36 = vld [vmem:[%s3318_s24] ss:$0 sm:$0xff] }
 0x381   : > { %1171 = vmax.xlane.f32.xlu1 %v1170_v37  ;;  %v1331_v38 = vpop.f32.mrf.mxu0 }
 0x382   : > { %v1332_v39 = vadd.f32 %v1331_v38, %v968_v33 }
 0x383   : > { %v2928_v40 = vpop.f32.mrf.mxu0 }
 0x384   : > { %v1335_v41 = vsel %vm1169_vm4, %v1332_v39, -inf }
 0x385   : > { %1336 = vmax.xlane.f32.xlu0 %v1335_v41 }
 0x392   : > { %1179 = vrot.lane.b32.xlu1 %v1081_v23, %s3251_s5  ;;  %s945_s5 = scalar_lea.vmem %s3748_s9, %s3463_s16 }
 0x393   : > { %v958_v26 = vld [vmem:[%s945_s5] sm:$0xff] }
 0x39b   : > { %1344 = vrot.lane.b32.xlu0 %v1081_v23, %s3252_s23  ;;  %v1607_v23 = vld [vmem:[%s3323_s30 + $0x10] sm:$0xff]  ;;  %s3750_s23 = sld [smem:[#allocation7_spill]] }
 0x3a1   : > { %s948_s5 = scalar_lea.vmem %s3750_s23, %s3460_s2  ;;  %s3752_s2 = smov 80  }
 0x3a2   : > { %s3753_s23 = sld [smem:[#allocation14_spill]] }
 0x40a   : > { %v1172_v42 = vpop.xlane.xlu1 %1171 }
 0x40b   : > { %v1173_v43 = vsub.f32 %v1166_v35, %v1172_v42 }
 0x40d   : > { %v1174_v44 = vmul.f32 1.442695, %v1173_v43  ;;  %v2812_v43 = vld [vmem:[%s3749_s6] ss:$0 sm:$0xff]  ;;  %s929_s6 = sand.u32 1, %s3206_s10  }
 0x40e   : > { %v1180_v45 = vpop.permute.xlu1 %1179  ;;  %v1337_v46 = vpop.xlane.xlu0 %1336  ;;  %s3665_s8 = sshll.u32 %s929_s6, 3  ;;  %s2623_s9 = scalar_lea.sflag [#allocation3], %s929_s6 }
 0x40f   : > { %3126 = vpow2.f32 %v1174_v44  ;;  %v1338_v47 = vsub.f32 %v1332_v39, %v1337_v46  ;;  %2920 = vmatpush3.msra.mxu1 %v1180_v45  ;;  %v2814_v39 = vld [vmem:[%s3338_s20] ss:$0 sm:$0xff] }
 0x410   : > { %2929 = vmatprep.subr.mxu1 %v3245_v8 }
 0x411   : > { %v1339_v48 = vmul.f32 1.442695, %v1338_v47 }
 0x412   : > { %v1345_v50 = vpop.permute.xlu0 %1344 }
 0x413   : > { %3128 = vpow2.f32 %v1339_v48 }
 0x41c   : > { %v3127_v49 = vpop.eup %3126 }
 0x41d   : > { %2922 = vmatmul.mubr.msk.f32.vlgmr.msra.gmra.mxu1 %vm1169_vm4, %v3127_v49  ;;  %v1176_v51 = vsel %vm1169_vm4, %v3127_v49, 0.0 }
 0x41e   : > { %2930 = vmatpush3.msra.mxu1 %v1345_v50  ;;  %1177 = vadd.xlane.f32.xlu1 %v1176_v51  ;;  %v959_v50 = vld [vmem:[%s948_s5] sm:$0x1]  ;;  %s3754_s5 = sld [smem:[#allocation15_spill]] }
 0x41f   : > { %2931 = vmatprep.mubr.msk.f32.mxu1 %vm3246_vm1, %v3245_v8  ;;  %2941 = vmatprep.subr.mxu1 %v3245_v8  ;;  %v961_v51 = vsub.f32 1.0, %v959_v50 }
 0x420   : > { %v3129_v52 = vpop.eup %3128 }
 0x421   : > { %2932 = vmatmul.mubr.msk.f32.vlgmr.msra.gmra.mxu1 %vm1169_vm4, %v3129_v52  ;;  %v1341_v53 = vsel %vm1169_vm4, %v3129_v52, 0.0  ;;  %v962_v52 = vmul.f32 -1e+09, %v961_v51 }
 0x422   : > { %1342 = vadd.xlane.f32.xlu0 %v1341_v53  ;;  %2945 = vmatprep.mubr.msk.f32.mxu1 %vm3246_vm1, %v3245_v8  ;;  %v1782_v53 = vsub.s32 0, %v3505_v30 }
 0x423   : > { %2942 = vmatpush3.msra.mxu1 %v1085_v54 }
 0x424   : > { %2943 = vmatprep.subr.mxu1 %v3245_v8  ;;  %v1783_v54 = vrot.slane %v962_v52, %v1782_v53 }
 0x425   : > { %2944 = vmatpush3.msra.mxu1 %v1084_v55 }
 0x426   : > { %2959 = vmatprep.subr.mxu1 %v3245_v8 }
 0x4a7   : > { %v1178_v58 = vpop.xlane.xlu1 %1177 }
 0x4a8   : > { %3130 = vrcp.f32 %v1178_v58 }
 0x4ab   : > { %v1343_v59 = vpop.xlane.xlu0 %1342 }
 0x4ac   : > { %3132 = vrcp.f32 %v1343_v59 }
 0x4b5   : > { %v3131_v60 = vpop.eup %3130 }
 0x4b9   : > { %v3133_v0 = vpop.eup %3132 }
 0x4dd   : > { %v1251_v61 = vpop.f32.mrf.mxu1 }
 0x4de   : > { %v1256_v62 = vmul.f32 %v3131_v60, %v1251_v61 }
 0x4df   : > { %v2923_v63 = vpop.f32.mrf.mxu1 }
 0x4e0   : > { %2946 = vmatmul.mubr.msk.f32.vlgmr.msra.gmra.mxu1 %vm1093_vm2, %v1256_v62 }
 0x4e1   : > { %v1416_v1 = vpop.f32.mrf.mxu1  ;;  %2967 = vmatprep.mubr.msk.f32.mxu1 %vm3246_vm1, %v3245_v8  ;;  %2960 = vmatpush3.msra.mxu1 %v1692_v19 }
 0x4e2   : > { %v1421_v2 = vmul.f32 %v3133_v0, %v1416_v1  ;;  %2961 = vmatprep.subr.mxu1 %v3245_v8 }
 0x4e3   : > { %v2933_v3 = vpop.f32.mrf.mxu1 }
 0x4e4   : > { %2939 = vmatmul.mubr.msk.f32.vlgmr.msra.gmra.mxu0 %vm1093_vm2, %v1421_v2 }
 0x4e5   : > { %2956 = vmatprep.mubr.msk.f32.mxu0 %vm3246_vm1, %v3245_v8  ;;  %2949 = vmatpush3.msra.mxu0 %v1608_v21 }
 0x4e6   : > { %2950 = vmatprep.subr.mxu0 %v3245_v8 }
 0x4e7   : > { %2951 = vmatpush3.msra.mxu0 %v1607_v23 }
 0x4e8   : > { %2952 = vmatprep.subr.mxu0 %v3245_v8 }
 0x4e9   : > { %2953 = vmatpush3.msra.mxu0 %v1606_v25 }
 0x4ea   : > { %2954 = vmatprep.subr.mxu0 %v3245_v8 }
 0x4eb   : > { %2955 = vmatpush3.msra.mxu0 %v1605_v27  ;;  %v2824_v27 = vld [vmem:[%s3754_s5] ss:$0 sm:$0xff]  ;;  %s3757_s5 = sld [smem:[#allocation17_spill]] }
 0x4ec   : > { %2970 = vmatprep.subr.mxu0 %v3245_v8 }
 0x4f1   : > { %v2826_v51 = vld [vmem:[%s3757_s5] ss:$0 sm:$0xff]  ;;  %s3760_s5 = sld [smem:[#allocation21_spill]] }
 0x5a0   : > { %v1564_v4 = vpop.f32.mrf.mxu1 }
 0x5a2   : > { %v2947_v5 = vpop.f32.mrf.mxu1 }
 0x5a4   : > { %v1491_v7 = vpop.f32.mrf.mxu0 }
 0x5a5   : > { %v1565_v9 = vadd.f32 %v1564_v4, %v1491_v7 }
 0x5a6   : > { %v2940_v10 = vpop.f32.mrf.mxu0 }
 0x5a7   : > { %v1574_v11 = vadd.f32 %v2809_v6, %v1565_v9  ;;  %v1774_v9 = vld [vmem:[%s3753_s23 + $0x8] sm:$0xff] }
 0x5a9   : > { %v1575_v12 = vadd.f32 %v1574_v11, %v3485_v20  ;;  %v1691_v20 = vld [vmem:[%s3741_s12 + $0x10] sm:$0xff] }
 0x5aa   : > { %2962 = vmatpush3.msra.mxu1 %v1691_v20 }
 0x5ab   : > { %v1578_v13 = vsel %vm971_vm0, %v1575_v12, 0.0  ;;  %2963 = vmatprep.subr.mxu1 %v3245_v8 }
 0x5ac   : > { %1579 = vadd.xlane.f32.xlu1 %v1578_v13  ;;  %2964 = vmatpush3.msra.mxu1 %v1690_v22 }
 0x5ad   : > { %2965 = vmatprep.subr.mxu1 %v3245_v8 }
 0x5ae   : > { %2966 = vmatpush3.msra.mxu1 %v1689_v24 }
 0x5af   : > { %2968 = vmatmul.mubr.msk.f32.vlgmr.msra.gmra.mxu1 %vm971_vm0, %v958_v26  ;;  %2975 = vmatprep.subr.mxu1 %v3245_v8 }
 0x5b0   : > { %2977 = vmatprep.mubr.msk.f32.mxu1 %vm3246_vm1, %v3245_v8 }
 0x635   : > { %v1580_v14 = vpop.xlane.xlu1 %1579 }
 0x636   : > { %v1581_v15 = vmul.f32 0.03125, %v1580_v14  ;;  %v1776_v14 = vld [vmem:[%s3753_s23 + $0x18] sm:$0xff] }
 0x638   : > { %v1582_v16 = vsub.f32 %v1575_v12, %v1581_v15  ;;  %v1773_v12 = vld [vmem:[%s3753_s23] sm:$0xff]  ;;  %v1775_v15 = vld [vmem:[%s3753_s23 + $0x10] sm:$0xff] }
 0x63a   : > { %v1583_v17 = vmul.f32 %v1582_v16, %v1582_v16 }
 0x63c   : > { %v1584_v18 = vsel %vm971_vm0, %v1583_v17, 0.0 }
 0x63d   : > { %1585 = vadd.xlane.f32.xlu1 %v1584_v18 }
 0x66f   : > { %v1769_v40 = vpop.f32.mrf.mxu1 }
 0x670   : > { %v1770_v41 = vadd.f32 %v2814_v39, %v1769_v40 }
 0x671   : > { %v2969_v42 = vpop.f32.mrf.mxu1 }
 0x672   : > { %1950 = vrot.lane.b32.xlu1 %v1770_v41, %s3248_s22 }
 0x6c6   : > { %v1586_v28 = vpop.xlane.xlu1 %1585 }
 0x6c7   : > { %v1587_v29 = vmul.f32 0.03125, %v1586_v28 }
 0x6c9   : > { %v1588_v32 = vadd.f32 1e-05, %v1587_v29 }
 0x6cb   : > { %3134 = vrsqrt.f32 %v1588_v32 }
 0x6d8   : > { %v3135_v33 = vpop.eup %3134 }
 0x6d9   : > { %v1590_v35 = vmul.f32 %v3135_v33, %v1582_v16 }
 0x6db   : > { %v1597_v37 = vmul.f32 %v2810_v34, %v1590_v35 }
 0x6dd   : > { %v3564_v38 = vadd.f32 %v2811_v36, %v1597_v37 }
 0x6df   : > { %2957 = vmatmul.mubr.msk.f32.vlgmr.msra.gmra.mxu0 %vm971_vm0, %v3564_v38 }
 0x6e0   : > { %2972 = vmatprep.mubr.msk.f32.mxu0 %vm3246_vm1, %v3245_v8  ;;  %2971 = vmatpush3.xpose.msk.msra.mxu0 %vm1093_vm2, %v1770_v41 }
 0x6e1   : > { %2980 = vmatprep.subr.mxu0 %v3245_v8 }
 0x6e4   : > { %v1951_v48 = vpop.permute.xlu1 %1950 }
 0x79f   : > { %v1685_v44 = vpop.f32.mrf.mxu0 }
 0x7a0   : > { %v1686_v45 = vadd.f32 %v2812_v43, %v1685_v44 }
 0x7a1   : > { %v2958_v46 = vpop.f32.mrf.mxu0 }
 0x7a2   : > { %v1778_v47 = vmul.f32 0.25, %v1686_v45 }
 0x7a4   : > { %1948 = vrot.lane.b32.xlu0 %v1778_v47, %s3248_s22  ;;  %2973 = vmatmul.mubr.msk.f32.vlgmr.msra.gmra.mxu0 %vm1093_vm2, %v1778_v47  ;;  %s3751_s22 = smov 96  }
 0x7a5   : > { %2981 = vmatpush3.xpose.msk.msra.mxu0 %vm1093_vm2, %v1951_v48  ;;  %2982 = vmatprep.mubr.msk.f32.mxu0 %vm3246_vm1, %v3245_v8 }
 0x7a6   : > { %2990 = vmatprep.subr.mxu0 %v3245_v8 }
 0x816   : > { %v1949_v49 = vpop.permute.xlu0 %1948 }
 0x817   : > { %2983 = vmatmul.mubr.msk.f32.vlgmr.msra.gmra.mxu0 %vm1093_vm2, %v1949_v49 }
 0x818   : > { %2994 = vmatprep.mubr.msk.f32.mxu0 %vm3246_vm1, %v3245_v8  ;;  %2991 = vmatpush3.msra.mxu0 %v1776_v14 }
 0x819   : > { %2992 = vmatprep.subr.mxu0 %v3245_v8 }
 0x81a   : > { %2993 = vmatpush3.msra.mxu0 %v1775_v15 }
 0x81b   : > { %3004 = vmatprep.subr.mxu0 %v3245_v8 }
 0x864   : > { %v1857_v55 = vpop.f32.mrf.mxu0 }
 0x865   : > { %v1858_v56 = vadd.f32 %v1857_v55, %v1783_v54  ;;  %v2307_v55 = vld [vmem:[%s3758_s3 + $0x30] sm:$0xff] }
 0x866   : > { %v2974_v57 = vpop.f32.mrf.mxu0 }
 0x867   : > { %v1861_v58 = vsel %vm1169_vm4, %v1858_v56, -inf  ;;  %v2305_v57 = vld [vmem:[%s3758_s3 + $0x20] sm:$0xff] }
 0x868   : > { %1862 = vmax.xlane.f32.xlu1 %v1861_v58  ;;  %v2304_v58 = vld [vmem:[%s3758_s3 + $0x18] sm:$0xff] }
 0x879   : > { %1870 = vrot.lane.b32.xlu1 %v1770_v41, %s3751_s22  ;;  %s3755_s22 = sld [smem:[#allocation18_spill]] }
 0x87f   : > { %v2299_v42 = vld [vmem:[%s3755_s22 + $0x18] sm:$0xff]  ;;  %v2298_v43 = vld [vmem:[%s3755_s22 + $0x10] sm:$0xff]  ;;  %v2297_v44 = vld [vmem:[%s3755_s22 + $0x8] sm:$0xff] }
 0x8d7   : > { %v2022_v59 = vpop.f32.mrf.mxu0 }
 0x8d8   : > { %v2023_v60 = vadd.f32 %v2022_v59, %v1783_v54  ;;  %v2308_v54 = vld [vmem:[%s3758_s3 + $0x38] sm:$0xff]  ;;  %v2303_v59 = vld [vmem:[%s3758_s3 + $0x10] sm:$0xff] }
 0x8d9   : > { %v2984_v61 = vpop.f32.mrf.mxu0 }
 0x8da   : > { %v2026_v62 = vsel %vm1169_vm4, %v2023_v60, -inf  ;;  %v2301_v61 = vld [vmem:[%s3758_s3] sm:$0xff] }
 0x8db   : > { %2027 = vmax.xlane.f32.xlu0 %v2026_v62 }
 0x8f1   : > { %v1863_v63 = vpop.xlane.xlu1 %1862  ;;  %2035 = vrot.lane.b32.xlu0 %v1770_v41, %s3752_s2  ;;  %s3756_s2 = sld [smem:[#allocation16_spill]] }
 0x8f2   : > { %v1864_v0 = vsub.f32 %v1858_v56, %v1863_v63  ;;  %v2306_v56 = vld [vmem:[%s3758_s3 + $0x28] sm:$0xff] }
 0x8f4   : > { %v1865_v30 = vmul.f32 1.442695, %v1864_v0 }
 0x8f5   : > { %v1871_v1 = vpop.permute.xlu1 %1870 }
 0x8f6   : > { %3136 = vpow2.f32 %v1865_v30  ;;  %2976 = vmatpush3.msra.mxu1 %v1871_v1 }
 0x8f7   : > { %2985 = vmatprep.subr.mxu1 %v3245_v8  ;;  %v2825_v49 = vld [vmem:[%s3756_s2] ss:$0 sm:$0xff]  ;;  %s3759_s2 = sld [smem:[#allocation19_spill]] }
 0x8fd   : > { %v2827_v62 = vld [vmem:[%s3759_s2] ss:$0 sm:$0xff]  ;;  %s3761_s2 = sld [smem:[#allocation22_spill]] }
 0x903   : > { %v3137_v2 = vpop.eup %3136 }
 0x904   : > { %2978 = vmatmul.mubr.msk.f32.vlgmr.msra.gmra.mxu1 %vm1169_vm4, %v3137_v2  ;;  %v1867_v3 = vsel %vm1169_vm4, %v3137_v2, 0.0 }
 0x905   : > { %1868 = vadd.xlane.f32.xlu1 %v1867_v3  ;;  %2987 = vmatprep.mubr.msk.f32.mxu1 %vm3246_vm1, %v3245_v8 }
 0x964   : > { %v2028_v4 = vpop.xlane.xlu0 %2027 }
 0x965   : > { %v2029_v5 = vsub.f32 %v2023_v60, %v2028_v4  ;;  %v2302_v60 = vld [vmem:[%s3758_s3 + $0x8] sm:$0xff]  ;;  %s3764_s3 = sld [smem:[#allocation8_spill]] }
 0x967   : > { %v2030_v6 = vmul.f32 1.442695, %v2029_v5 }
 0x968   : > { %v2036_v7 = vpop.permute.xlu0 %2035 }
 0x969   : > { %3138 = vpow2.f32 %v2030_v6  ;;  %2986 = vmatpush3.msra.mxu1 %v2036_v7 }
 0x96a   : > { %2997 = vmatprep.subr.mxu1 %v3245_v8 }
 0x976   : > { %v3139_v10 = vpop.eup %3138 }
 0x977   : > { %2988 = vmatmul.mubr.msk.f32.vlgmr.msra.gmra.mxu1 %vm1169_vm4, %v3139_v10  ;;  %v2032_v11 = vsel %vm1169_vm4, %v3139_v10, 0.0 }
 0x978   : > { %2033 = vadd.xlane.f32.xlu0 %v2032_v11  ;;  %2998 = vmatpush3.msra.mxu1 %v1774_v9  ;;  %v2829_v11 = vld [vmem:[%s3760_s5] ss:$0 sm:$0xff]  ;;  %s3762_s5 = sld [smem:[#allocation23_spill]] }
 0x979   : > { %2999 = vmatprep.subr.mxu1 %v3245_v8  ;;  %3001 = vmatprep.mubr.msk.f32.mxu1 %vm3246_vm1, %v3245_v8 }
 0x97a   : > { %3000 = vmatpush3.msra.mxu1 %v1773_v12 }
 0x97b   : > { %3015 = vmatprep.subr.mxu1 %v3245_v8 }
 0x98e   : > { %v1869_v13 = vpop.xlane.xlu1 %1868 }
 0x98f   : > { %3140 = vrcp.f32 %v1869_v13 }
 0x99c   : > { %v3141_v16 = vpop.eup %3140 }
 0x9c4   : > { %v1942_v17 = vpop.f32.mrf.mxu1 }
 0x9c5   : > { %v1947_v18 = vmul.f32 %v3141_v16, %v1942_v17 }
 0x9c6   : > { %v2979_v19 = vpop.f32.mrf.mxu1 }
 0x9c7   : > { %3002 = vmatmul.mubr.msk.f32.vlgmr.msra.gmra.mxu1 %vm1093_vm2, %v1947_v18 }
 0x9c8   : > { %3031 = vmatprep.mubr.msk.f32.mxu1 %vm3246_vm1, %v3245_v8  ;;  %3016 = vmatpush3.msra.mxu1 %v2308_v54 }
 0x9c9   : > { %3017 = vmatprep.subr.mxu1 %v3245_v8 }
 0x9ca   : > { %3018 = vmatpush3.msra.mxu1 %v2307_v55 }
 0x9cb   : > { %3019 = vmatprep.subr.mxu1 %v3245_v8 }
 0x9cc   : > { %3020 = vmatpush3.msra.mxu1 %v2306_v56 }
 0x9cd   : > { %3021 = vmatprep.subr.mxu1 %v3245_v8 }
 0x9ce   : > { %3022 = vmatpush3.msra.mxu1 %v2305_v57 }
 0x9cf   : > { %3023 = vmatprep.subr.mxu1 %v3245_v8 }
 0x9d0   : > { %3024 = vmatpush3.msra.mxu1 %v2304_v58 }
 0x9d1   : > { %3025 = vmatprep.subr.mxu1 %v3245_v8 }
 0x9d2   : > { %3026 = vmatpush3.msra.mxu1 %v2303_v59 }
 0x9d3   : > { %3027 = vmatprep.subr.mxu1 %v3245_v8 }
 0x9d4   : > { %3028 = vmatpush3.msra.mxu1 %v2302_v60 }
 0x9d5   : > { %3029 = vmatprep.subr.mxu1 %v3245_v8 }
 0x9d6   : > { %3030 = vmatpush3.msra.mxu1 %v2301_v61 }
 0xa01   : > { %v2034_v20 = vpop.xlane.xlu0 %2033 }
 0xa02   : > { %3142 = vrcp.f32 %v2034_v20 }
 0xa0f   : > { %v3143_v21 = vpop.eup %3142 }
 0xa37   : > { %v2107_v22 = vpop.f32.mrf.mxu1 }
 0xa38   : > { %v2112_v23 = vmul.f32 %v3143_v21, %v2107_v22  ;;  %v2511_v22 = vld [vmem:[%s3740_s17 + $0x18] sm:$0xff] }
 0xa39   : > { %v2989_v24 = vpop.f32.mrf.mxu1 }
 0xa3a   : > { %2995 = vmatmul.mubr.msk.f32.vlgmr.msra.gmra.mxu0 %vm1093_vm2, %v2112_v23  ;;  %v2510_v23 = vld [vmem:[%s3740_s17 + $0x10] sm:$0xff]  ;;  %v2509_v24 = vld [vmem:[%s3740_s17 + $0x8] sm:$0xff] }
 0xa3b   : > { %3012 = vmatprep.mubr.msk.f32.mxu0 %vm3246_vm1, %v3245_v8  ;;  %3005 = vmatpush3.msra.mxu0 %v2299_v42 }
 0xa3c   : > { %3006 = vmatprep.subr.mxu0 %v3245_v8 }
 0xa3d   : > { %3007 = vmatpush3.msra.mxu0 %v2298_v43  ;;  %v3253_v43 = vmov 0  }
 0xa3e   : > { %3008 = vmatprep.subr.mxu0 %v3245_v8  ;;  %3122 = vset.pattern.permute.xlu1 %v3253_v43 }
 0xa3f   : > { %3009 = vmatpush3.msra.mxu0 %v2297_v44  ;;  %3123 = vset.pattern.permute.xlu0 %v3253_v43 }
 0xa40   : > { %3010 = vmatprep.subr.mxu0 %v3245_v8 }
 0xa87   : > { %v2255_v25 = vpop.f32.mrf.mxu1 }
 0xa89   : > { %v3003_v26 = vpop.f32.mrf.mxu1 }
 0xafa   : > { %v2182_v28 = vpop.f32.mrf.mxu0 }
 0xafb   : > { %v2256_v29 = vadd.f32 %v2255_v25, %v2182_v28  ;;  %v2508_v25 = vld [vmem:[%s3740_s17] sm:$0xff] }
 0xafc   : > { %v2996_v32 = vpop.f32.mrf.mxu0 }
 0xafd   : > { %v2265_v33 = vadd.f32 %v2824_v27, %v2256_v29  ;;  %v2831_v32 = vld [vmem:[%s3761_s2] ss:$0 sm:$0xff]  ;;  %s931_s2 = scalar_lea.vmem [#allocation2], %s3665_s8 }
 0xafe   : > { %s2640_s8 = sshll.u32 %s931_s2, 4  ;;  %s2641_s8 = int_to_ptr.vmem [resolvable:$true] %s2640_s8 }
 0xaff   : > { %v2266_v34 = vadd.f32 %v2265_v33, %v3564_v38  ;;  %v2296_v38 = vld [vmem:[%s3755_s22] sm:$0xff]  ;;  %s3154_s12 = scalar_lea.vmem %s2641_s8, 128 }
 0xb00   : > { %3011 = vmatpush3.msra.mxu0 %v2296_v38  ;;  %p3155_p11 = scmp.ne.s32.totalorder %s2641_s8, %s3154_s12 }
 0xb01   : > { %v2269_v35 = vsel %vm971_vm0, %v2266_v34, 0.0  ;;  %3034 = vmatprep.subr.mxu0 %v3245_v8 }
 0xb02   : > { %2270 = vadd.xlane.f32.xlu1 %v2269_v35  ;;  %p3156_p12 = pnand %p3155_p11, %p3448_p5 }
 0xb04   : > { %p3157_p13 = pneg %p3156_p12 }
 0xb8b   : > { %v2271_v36 = vpop.xlane.xlu1 %2270 }
 0xb8c   : > { %v2272_v37 = vmul.f32 0.03125, %v2271_v36 }
 0xb8e   : > { %v2273_v39 = vsub.f32 %v2266_v34, %v2272_v37  ;;  %v2832_v34 = vld [vmem:[%s3762_s5] ss:$0 sm:$0xff]  ;;  %s952_s5 = scalar_lea.vmem %s3764_s3, %s3463_s16  ;;  %s2838_s3 = sshll.u32 %s3431_s0, 7 }
 0xb8f   : > { %v2833_v37 = vld [vmem:[%s3763_s13] ss:$0 sm:$0xff]  ;;  %s3254_s13 = smov [#allocation2]  }
 0xb90   : > { %v2274_v40 = vmul.f32 %v2273_v39, %v2273_v39  ;;  %v960_v44 = vld [vmem:[%s952_s5] sm:$0xff]  ;;  %s2638_s5 = scalar_lea.hbm %s3403_s27, %s2838_s3  ;;  %s3158_s14 = sshll.u32 %s3254_s13, 4  ;;  %s3159_s14 = int_to_ptr.vmem [resolvable:$false] %s3158_s14 }
 0xb91   : > { %s3160_s17 = scalar_lea.vmem %s3159_s14, 256  ;;  %p3161_p0 = scmp.lt.s32.totalorder %s2641_s8, %s3159_s14 }
 0xb92   : > { %v2275_v41 = vsel %vm971_vm0, %v2274_v40, 0.0  ;;  %p3162_p1 = scmp.lt.s32.totalorder %s3160_s17, %s3154_s12 }
 0xb93   : > { %2276 = vadd.xlane.f32.xlu1 %v2275_v41 }
 0xb94   : > { %p3163_p2 = por %p3162_p1, %p3161_p0 }
 0xb96   : > { %p3164_p3 = pnand %p3163_p2, %p3157_p13 }
 0xc1c   : > { %v2277_v45 = vpop.xlane.xlu1 %2276 }
 0xc1d   : > { %v2278_v46 = vmul.f32 0.03125, %v2277_v45 }
 0xc1f   : > { %v2279_v47 = vadd.f32 1e-05, %v2278_v46 }
 0xc21   : > { %3144 = vrsqrt.f32 %v2279_v47 }
 0xc2e   : > { %v3145_v48 = vpop.eup %3144 }
 0xc2f   : > { %v2281_v50 = vmul.f32 %v3145_v48, %v2273_v39 }
 0xc31   : > { %v2288_v52 = vmul.f32 %v2825_v49, %v2281_v50 }
 0xc33   : > { %v2295_v53 = vadd.f32 %v2826_v51, %v2288_v52 }
 0xc35   : > { %3013 = vmatmul.mubr.msk.f32.vlgmr.msra.gmra.mxu0 %vm971_vm0, %v2295_v53 }
 0xc36   : > { %3042 = vmatprep.mubr.msk.f32.mxu0 %vm3246_vm1, %v3245_v8  ;;  %3035 = vmatpush3.msra.mxu0 %v2511_v22 }
 0xc37   : > { %3036 = vmatprep.subr.mxu0 %v3245_v8 }
 0xc38   : > { %3037 = vmatpush3.msra.mxu0 %v2510_v23 }
 0xc39   : > { %3038 = vmatprep.subr.mxu0 %v3245_v8 }
 0xc3a   : > { %3039 = vmatpush3.msra.mxu0 %v2509_v24 }
 0xc3b   : > { %3040 = vmatprep.subr.mxu0 %v3245_v8 }
 0xc3c   : > { %3041 = vmatpush3.msra.mxu0 %v2508_v25 }
 0xcf5   : > { %v2385_v63 = vpop.f32.mrf.mxu0 }
 0xcf6   : > { %v2386_v0 = vadd.f32 %v2827_v62, %v2385_v63 }
 0xcf7   : > { %v3014_v30 = vpop.f32.mrf.mxu0 }
 0xcf8   : > { %v2389_v1 = vmul.f32 %v2386_v0, %v2386_v0 }
 0xcfa   : > { %v2390_v2 = vmul.f32 %v2389_v1, %v2386_v0 }
 0xcfc   : > { %v2391_v3 = vmul.f32 0.044715, %v2390_v2 }
 0xcfe   : > { %v2392_v4 = vadd.f32 %v2391_v3, %v2386_v0 }
 0xd00   : > { %v2393_v5 = vmul.f32 0.7978846, %v2392_v4 }
 0xd02   : > { %3146 = vtanh.f32 %v2393_v5 }
 0xd0f   : > { %v3147_v6 = vpop.eup %3146 }
 0xd10   : > { %v2395_v7 = vadd.f32 1.0, %v3147_v6 }
 0xd12   : > { %v2396_v9 = vmul.f32 0.5, %v2395_v7 }
 0xd14   : > { %v2397_v10 = vmul.f32 %v2396_v9, %v2386_v0 }
 0xd16   : > { %3032 = vmatmul.mubr.msk.f32.vlgmr.msra.gmra.mxu1 %vm2404_vm5, %v2397_v10 }
 0xdd6   : > { %v2474_v12 = vpop.f32.mrf.mxu1 }
 0xdd7   : > { %v2475_v13 = vadd.f32 %v2829_v11, %v2474_v12 }
 0xdd8   : > { %v3033_v14 = vpop.f32.mrf.mxu1 }
 0xdd9   : > { %v2478_v15 = vadd.f32 %v2475_v13, %v2295_v53 }
 0xddb   : > { %v2481_v16 = vsel %vm971_vm0, %v2478_v15, 0.0 }
 0xddc   : > { %2482 = vadd.xlane.f32.xlu1 %v2481_v16 }
 0xe65   : > { %v2483_v17 = vpop.xlane.xlu1 %2482 }
 0xe66   : > { %v2484_v18 = vmul.f32 0.03125, %v2483_v17 }
 0xe68   : > { %v2485_v19 = vsub.f32 %v2478_v15, %v2484_v18 }
 0xe6a   : > { %v2486_v20 = vmul.f32 %v2485_v19, %v2485_v19 }
 0xe6c   : > { %v2487_v21 = vsel %vm971_vm0, %v2486_v20, 0.0 }
 0xe6d   : > { %2488 = vadd.xlane.f32.xlu0 %v2487_v21 }
 0xef6   : > { %v2489_v26 = vpop.xlane.xlu0 %2488 }
 0xef7   : > { %v2490_v27 = vmul.f32 0.03125, %v2489_v26 }
 0xef9   : > { %v2491_v28 = vadd.f32 1e-05, %v2490_v27 }
 0xefb   : > { %3148 = vrsqrt.f32 %v2491_v28 }
 0xf08   : > { %v3149_v29 = vpop.eup %3148 }
 0xf09   : > { %v2493_v33 = vmul.f32 %v3149_v29, %v2485_v19 }
 0xf0b   : > { %v2500_v35 = vmul.f32 %v2831_v32, %v2493_v33 }
 0xf0d   : > { %v2507_v36 = vadd.f32 %v2832_v34, %v2500_v35 }
 0xf0f   : > { %3043 = vmatmul.mubr.msk.f32.vlgmr.msra.gmra.mxu0 %vm971_vm0, %v2507_v36 }
 0xfcf   : > { %v2588_v39 = vpop.f32.mrf.mxu0 }
 0xfd0   : > { %v2589_v40 = vadd.f32 %v2833_v37, %v2588_v39 }
 0xfd1   : > { %v3044_v41 = vpop.f32.mrf.mxu0 }
 0xfd2   : > { %v2592_v42 = vsel %vm2404_vm5, %v2589_v40, -inf  ;;  %2618 = vst.msk [vmem:[%s931_s2] sm:$0xff] %vm2404_vm5, %v2589_v40 }
 0xfd3   : > { %2593 = vmax.xlane.f32.xlu1 %v2592_v42 }
 0xfe4   : > { %2605 = vperm.xlu1 %3122, %v960_v44  }
0x105c   : > { %v2594_v38 = vpop.xlane.xlu1 %2593 }
0x105d   : > { %v2595_v45 = vsub.f32 %v2589_v40, %v2594_v38 }
0x105f   : > { %v2596_v46 = vmul.f32 1.442695, %v2595_v45 }
0x1060   : > { %v2606_v50 = vpop.permute.xlu1 %2605 }
0x1061   : > { %3150 = vpow2.f32 %v2596_v46  ;;  %vm2607_vm6 = vcmp.eq.s32.totalorder %v3507_v31, %v2606_v50 }
0x1062   : > { %v2835_v53 = vsel %vm2607_vm6, 1.0, %v3245_v8 }
0x106e   : > { %v3151_v47 = vpop.eup %3150 }
0x106f   : > { %v2598_v48 = vsel %vm2404_vm5, %v3151_v47, 0.0 }
0x1070   : > { %2599 = vadd.xlane.f32.xlu0 %v2598_v48 }
0x10f9   : > { %v2600_v49 = vpop.xlane.xlu0 %2599 }
0x10fa   : > { %3152 = vlog2.f32 %v2600_v49 }
0x1107   : > { %v3153_v51 = vpop.eup %3152 }
0x1108   : > { %v2602_v52 = vmul.f32 0.6931472, %v3153_v51 }
0x110a   : > { %v2603_v54 = vsub.f32 %v2595_v45, %v2602_v52 }
0x110c   : > { %v2610_v55 = vmul.f32 %v2835_v53, %v2603_v54 }
0x110e   : > { %v2611_v56 = vsel %vm2404_vm5, %v2610_v55, 0.0 }
0x110f   : > { %2612 = vadd.xlane.f32.xlu0 %v2611_v56 }
0x1110   : > { %3167 = shalt.err (!%p3164_p3)
}
0x1111   : > { %s3168_s0 = scalar_lea.hbm %s2638_s5, 128  ;;  %s3172_s6 = scalar_lea.hbm %s3403_s27, 256 }
0x1112   : > { %p3169_p4 = scmp.ne.s32.totalorder %s2638_s5, %s3168_s0  ;;  %p3173_p9 = scmp.lt.s32.totalorder %s2638_s5, %s3403_s27 }
0x1113   : > { %p3174_p10 = scmp.lt.s32.totalorder %s3172_s6, %s3168_s0 }
0x1114   : > { %p3170_p7 = pnand %p3169_p4, %p3448_p5 }
0x1115   : > { %p3175_p11 = por %p3174_p10, %p3173_p9 }
0x1116   : > { %p3171_p8 = pneg %p3170_p7 }
0x1118   : > { %p3176_p12 = pnand %p3175_p11, %p3171_p8 }
0x111a   : > { %3179 = shalt.err (!%p3176_p12)
}
0x111b   : > { %3045 = dma.vmem_to_hbm [thread:$0]  (%p3448_p5), %s2641_s8, 128, %s2638_s5, %s2623_s9   ;;  %vm2615_vm7 = vcmp.ne.s32.totalorder %v960_v44, 4294967196  ;;  %vm2620_vm8 = vcmask 7168  }
0x111c   : > { %v2836_v31 = vsel %vm2615_vm7, 1.0, %v3245_v8  ;;  %s956_s13 = scalar_lea.vmem %s3408_s4, %s3463_s16 }
0x1198   : > { %v2613_v57 = vpop.xlane.xlu0 %2612 }
0x1199   : > { %v2614_v58 = vsub.f32 0.0, %v2613_v57 }
0x119b   : > { %v2619_v59 = vmul.f32 %v2836_v31, %v2614_v58 }
0x119d   : > { %2621 = vst.msk [vmem:[%s956_s13] sm:$0xff] %vm2620_vm8, %v2619_v59 }
0x119e PF: > { %p3051_p13 = scmp.ge.s32.totalorder %s3214_s15, 2  ;;  %s2655_s17 = sand.u32 1, %s3202_s7  }
0x119f   : > { %s2656_s14 = scalar_lea.sflag [#allocation3], %s2655_s17 }
0x11a0   : > { %p3048_p0 = pnand %p3051_p13, %p3452_p6 }
0x11a2   : > { %p3049_p1 = pneg %p3048_p0 }
0x11a4   : > { %3197 = dma.done.wait (%p3049_p1), %s2656_s14, 128  }
0x11a5   : > { %3199 = vsyncadd (%p3049_p1), %s2656_s14, 4294967168  ;;  %p70_p5 = scmp.ge.s32.totalorder %s3435_s18, 4   ;;  %s3765_s7 = smov %s3206_s10 }
0x11a6   : > { %s3766_s10 = smov %s3210_s11  ;;  %s3767_s11 = smov %s3446_s26 }
0x11a7   : > { %s3768_s15 = smov %s3435_s18  ;;  %72 = sbr.rel (!%p70_p5) target bundleno = 57 (0x39), region = 217 }
0x11ac   :  { %2668 = vsyncpa [#allocation3], 1 }
0x11ad   :  { %2670 = vsyncpa [#allocation3 + $0x1], 1 }

</bundles_post_ra>
